<compile_context>
chip_gen: v6e
topology: v6e:2x2x1
jax: 0.10.0
libtpu: 0.0.40
codegen_flags: <defaults>
</compile_context>

<pallas_src>
import functools

import jax
import jax.numpy as jnp
from jax.experimental import pallas as pl
from jax.experimental.pallas import tpu as pltpu

IN_DIM, H1, H2, OUT_DIM = 28 * 28, 128, 64, 10
H2_PAD, OUT_PAD = 128, 128          # lane-dense padded widths


def _round_up(x, m):
    return ((x + m - 1) // m) * m


def _pick_bm(B, bm_target):
    """Batch tile: large (amortize per-step pipeline overhead) but capped so
    the 'parallel' batch grid keeps >= 2 steps (v7x has 2 TensorCores)."""
    bm_target = max(256, (bm_target // 256) * 256)        # multiple of 256
    bm = min(bm_target, _round_up(pl.cdiv(B, 2), 8))      # >= 2 grid steps
    return max(bm, 8)                                     # sublane-aligned


def mlp_kernel(x_ref, w1_ref, b1_ref, w2_ref, b2_ref, w3_ref, b3_ref, o_ref):
    # Cast x f32 -> bf16 on the VPU (free filler under the DMA/MXU); all
    # matmuls run on the bf16 MXU path with fp32 accumulation; bias adds and
    # ReLU stay fp32 on the VPU.
    x = x_ref[...].astype(w1_ref.dtype)
    # fc1 + ReLU
    h1 = jnp.dot(x, w1_ref[...], preferred_element_type=jnp.float32)
    h1 = jnp.maximum(h1 + b1_ref[...], 0.0)
    # fc2 + ReLU
    h2 = jnp.dot(h1.astype(w2_ref.dtype), w2_ref[...],
                 preferred_element_type=jnp.float32)
    h2 = jnp.maximum(h2 + b2_ref[...], 0.0)
    # fc3 (logits, no activation) -> lane-dense (bm, 128) store
    logits = jnp.dot(h2.astype(w3_ref.dtype), w3_ref[...],
                     preferred_element_type=jnp.float32)
    o_ref[...] = (logits + b3_ref[...]).astype(o_ref.dtype)


def prepare_params(params, compute_dtype=jnp.bfloat16):
    """One-time (outside the per-call / jitted path) pad + cast of weights.
    Zero-pads H2 -> 128 and OUT_DIM -> 128 for lane-dense MXU tiles."""
    w1 = params["w1"].astype(compute_dtype)                               # (784, 128)
    b1 = params["b1"].reshape(1, H1).astype(jnp.float32)                  # (1, 128)
    w2 = jnp.pad(params["w2"],
                 ((0, 0), (0, H2_PAD - H2))).astype(compute_dtype)        # (128, 128)
    b2 = jnp.pad(params["b2"].reshape(1, H2),
                 ((0, 0), (0, H2_PAD - H2))).astype(jnp.float32)          # (1, 128)
    w3 = jnp.pad(params["w3"],
                 ((0, H2_PAD - H2),
                  (0, OUT_PAD - OUT_DIM))).astype(compute_dtype)          # (128, 128)
    b3 = jnp.pad(params["b3"].reshape(1, OUT_DIM),
                 ((0, 0), (0, OUT_PAD - OUT_DIM))).astype(jnp.float32)    # (1, 128)
    return (w1, b1, w2, b2, w3, b3)


def mlp_forward(x, prepared, *, bm=512, out_dtype=jnp.float32):
    """x: (B, 784) float32 (native dtype; cast happens in-kernel).
    prepared: output of prepare_params(). Returns (B, 10) logits."""
    w1, b1, w2, b2, w3, b3 = prepared
    B = x.shape[0]
    bm = _pick_bm(B, bm)
    grid = (pl.cdiv(B, bm),)   # ragged last block: padded read, masked store

    out = pl.pallas_call(
        mlp_kernel,
        # NOTE: out_dtype=jnp.bfloat16 halves output HBM writeback if the
        # downstream consumer tolerates bf16 logits; default keeps f32.
        out_shape=jax.ShapeDtypeStruct((B, OUT_PAD), out_dtype),
        grid_spec=pltpu.PrefetchScalarGridSpec(
            num_scalar_prefetch=0,
            grid=grid,
            in_specs=[
                pl.BlockSpec((bm, IN_DIM), lambda i: (i, 0)),       # x tile (f32)
                pl.BlockSpec((IN_DIM, H1), lambda i: (0, 0)),       # w1 (whole)
                pl.BlockSpec((1, H1), lambda i: (0, 0)),            # b1
                pl.BlockSpec((H1, H2_PAD), lambda i: (0, 0)),       # w2 (padded)
                pl.BlockSpec((1, H2_PAD), lambda i: (0, 0)),        # b2
                pl.BlockSpec((H2_PAD, OUT_PAD), lambda i: (0, 0)),  # w3 (padded)
                pl.BlockSpec((1, OUT_PAD), lambda i: (0, 0)),       # b3
            ],
            out_specs=pl.BlockSpec((bm, OUT_PAD), lambda i: (i, 0)),
        ),
        compiler_params=pltpu.CompilerParams(
            dimension_semantics=("parallel",)),
    )(x, w1, b1, w2, b2, w3, b3)

    # Only lane padding to strip (no batch padding); fuses downstream under jit.
    return out[:, :OUT_DIM]


def init_params(key):
    """Deterministic init matching the PyTorch module's shapes.
    PyTorch nn.Linear weight is (out, in); we store its transpose (in, out)."""
    ks = jax.random.split(key, 6)

    def linear(kw, kb, fan_in, fan_out):
        bound = 1.0 / jnp.sqrt(fan_in)
        w = jax.random.uniform(kw, (fan_in, fan_out), jnp.float32, -bound, bound)
        b = jax.random.uniform(kb, (1, fan_out), jnp.float32, -bound, bound)
        return w, b

    w1, b1 = linear(ks[0], ks[1], IN_DIM, H1)
    w2, b2 = linear(ks[2], ks[3], H1, H2)
    w3, b3 = linear(ks[4], ks[5], H2, OUT_DIM)
    return {"w1": w1, "b1": b1, "w2": w2, "b2": b2, "w3": w3, "b3": b3}


if __name__ == "__main__":
    key = jax.random.PRNGKey(0)
    pkey, xkey = jax.random.split(key)
    params = init_params(pkey)
    prepared = prepare_params(params)   # one-time pad/cast, outside jit

    # Modest MNIST-like batch that (a) is ragged w.r.t. the tile and
    # (b) yields a 2-step "parallel" grid so the last-block masking path and
    # the v7x two-TC split are both exercised.
    B = 300
    x_img = jax.random.normal(xkey, (B, 1, 28, 28), jnp.float32)  # NCHW
    x = x_img.reshape(-1, IN_DIM)

    forward = jax.jit(functools.partial(mlp_forward, bm=512))
    out = jax.block_until_ready(forward(x, prepared))
    assert out.shape == (B, OUT_DIM)

    # Reference 1: mimic the kernel's bf16-input / fp32-accumulate math.
    xb = x.astype(jnp.bfloat16)
    w1b = params["w1"].astype(jnp.bfloat16)
    w2b = params["w2"].astype(jnp.bfloat16)
    w3b = params["w3"].astype(jnp.bfloat16)
    h1 = jnp.maximum(
        jnp.dot(xb, w1b, preferred_element_type=jnp.float32) + params["b1"], 0.0)
    h2 = jnp.maximum(
        jnp.dot(h1.astype(jnp.bfloat16), w2b,
                preferred_element_type=jnp.float32) + params["b2"], 0.0)
    ref_bf16 = (jnp.dot(h2.astype(jnp.bfloat16), w3b,
                        preferred_element_type=jnp.float32) + params["b3"])
    assert jnp.allclose(out, ref_bf16, atol=1e-2, rtol=1e-2)

    # Reference 2: pure fp32 forward (semantic check, looser tolerance for bf16).
    h1f = jnp.maximum(x @ params["w1"] + params["b1"], 0.0)
    h2f = jnp.maximum(h1f @ params["w2"] + params["b2"], 0.0)
    ref_f32 = h2f @ params["w3"] + params["b3"]
    assert jnp.allclose(out, ref_f32, atol=5e-2, rtol=5e-2)

    print("KERNEL_OK")
</pallas_src>

<mosaic_0001>
module attributes {stable_mosaic.version = 11 : i64} {
  func.func @mlp_kernel(%arg0: i32, %arg1: memref<152x784xf32, #tpu.memory_space<vmem>>, %arg2: memref<784x128xbf16, #tpu.memory_space<vmem>>, %arg3: memref<1x128xf32, #tpu.memory_space<vmem>>, %arg4: memref<128x128xbf16, #tpu.memory_space<vmem>>, %arg5: memref<1x128xf32, #tpu.memory_space<vmem>>, %arg6: memref<128x128xbf16, #tpu.memory_space<vmem>>, %arg7: memref<1x128xf32, #tpu.memory_space<vmem>>, %arg8: memref<152x128xf32, #tpu.memory_space<vmem>>) attributes {dimension_semantics = [#tpu.dimension_semantics<parallel>], iteration_bounds = array<i64: 2>, scalar_prefetch = 0 : i64, scratch_operands = 0 : i64, tpu.core_type = #tpu.core_type<tc>, window_params = [{transform_indices = @transform_0, window_bounds = array<i64: 152, 784>}, {pipeline_mode = #tpu.pipeline_mode<synchronous>, transform_indices = @transform_1, window_bounds = array<i64: 784, 128>}, {pipeline_mode = #tpu.pipeline_mode<synchronous>, transform_indices = @transform_2, window_bounds = array<i64: 1, 128>}, {pipeline_mode = #tpu.pipeline_mode<synchronous>, transform_indices = @transform_3, window_bounds = array<i64: 128, 128>}, {pipeline_mode = #tpu.pipeline_mode<synchronous>, transform_indices = @transform_4, window_bounds = array<i64: 1, 128>}, {pipeline_mode = #tpu.pipeline_mode<synchronous>, transform_indices = @transform_5, window_bounds = array<i64: 128, 128>}, {pipeline_mode = #tpu.pipeline_mode<synchronous>, transform_indices = @transform_6, window_bounds = array<i64: 1, 128>}, {transform_indices = @transform_7, window_bounds = array<i64: 152, 128>}]} {
    %c0 = arith.constant 0 : index
    %c0_0 = arith.constant 0 : index
    %0 = vector.load %arg1[%c0, %c0_0] : memref<152x784xf32, #tpu.memory_space<vmem>>, vector<152x784xf32>
    %1 = arith.truncf %0 : vector<152x784xf32> to vector<152x784xbf16>
    %c0_1 = arith.constant 0 : index
    %c0_2 = arith.constant 0 : index
    %2 = vector.load %arg2[%c0_1, %c0_2] : memref<784x128xbf16, #tpu.memory_space<vmem>>, vector<784x128xbf16>
    %cst = arith.constant dense<0.000000e+00> : vector<152x128xf32>
    %3 = tpu.matmul %1, %2, %cst {dimension_numbers = #tpu.dot_dimension_numbers<[1], [0], [0], [1], [0, 0, 1, 1], [], []>} : vector<152x784xbf16>, vector<784x128xbf16>, vector<152x128xf32> -> vector<152x128xf32>
    %c0_3 = arith.constant 0 : index
    %c0_4 = arith.constant 0 : index
    %4 = vector.load %arg3[%c0_3, %c0_4] : memref<1x128xf32, #tpu.memory_space<vmem>>, vector<1x128xf32>
    %5 = vector.broadcast %4 : vector<1x128xf32> to vector<152x128xf32>
    %6 = arith.addf %3, %5 : vector<152x128xf32>
    %cst_5 = arith.constant 0.000000e+00 : f32
    %7 = vector.broadcast %cst_5 : f32 to vector<152x128xf32>
    %8 = arith.maximumf %6, %7 : vector<152x128xf32>
    %9 = arith.truncf %8 : vector<152x128xf32> to vector<152x128xbf16>
    %c0_6 = arith.constant 0 : index
    %c0_7 = arith.constant 0 : index
    %10 = vector.load %arg4[%c0_6, %c0_7] : memref<128x128xbf16, #tpu.memory_space<vmem>>, vector<128x128xbf16>
    %cst_8 = arith.constant dense<0.000000e+00> : vector<152x128xf32>
    %11 = tpu.matmul %9, %10, %cst_8 {dimension_numbers = #tpu.dot_dimension_numbers<[1], [0], [0], [1], [0, 0, 1, 1], [], []>} : vector<152x128xbf16>, vector<128x128xbf16>, vector<152x128xf32> -> vector<152x128xf32>
    %c0_9 = arith.constant 0 : index
    %c0_10 = arith.constant 0 : index
    %12 = vector.load %arg5[%c0_9, %c0_10] : memref<1x128xf32, #tpu.memory_space<vmem>>, vector<1x128xf32>
    %13 = vector.broadcast %12 : vector<1x128xf32> to vector<152x128xf32>
    %14 = arith.addf %11, %13 : vector<152x128xf32>
    %cst_11 = arith.constant 0.000000e+00 : f32
    %15 = vector.broadcast %cst_11 : f32 to vector<152x128xf32>
    %16 = arith.maximumf %14, %15 : vector<152x128xf32>
    %17 = arith.truncf %16 : vector<152x128xf32> to vector<152x128xbf16>
    %c0_12 = arith.constant 0 : index
    %c0_13 = arith.constant 0 : index
    %18 = vector.load %arg6[%c0_12, %c0_13] : memref<128x128xbf16, #tpu.memory_space<vmem>>, vector<128x128xbf16>
    %cst_14 = arith.constant dense<0.000000e+00> : vector<152x128xf32>
    %19 = tpu.matmul %17, %18, %cst_14 {dimension_numbers = #tpu.dot_dimension_numbers<[1], [0], [0], [1], [0, 0, 1, 1], [], []>} : vector<152x128xbf16>, vector<128x128xbf16>, vector<152x128xf32> -> vector<152x128xf32>
    %c0_15 = arith.constant 0 : index
    %c0_16 = arith.constant 0 : index
    %20 = vector.load %arg7[%c0_15, %c0_16] : memref<1x128xf32, #tpu.memory_space<vmem>>, vector<1x128xf32>
    %21 = vector.broadcast %20 : vector<1x128xf32> to vector<152x128xf32>
    %22 = arith.addf %19, %21 : vector<152x128xf32>
    %c0_17 = arith.constant 0 : index
    %c0_18 = arith.constant 0 : index
    %23 = vector.load %arg8[%c0_17, %c0_18] : memref<152x128xf32, #tpu.memory_space<vmem>>, vector<152x128xf32>
    tpu.vector_store %arg8[%c0_17, %c0_18], %22 {strides = array<i32>} : memref<152x128xf32, #tpu.memory_space<vmem>>, vector<152x128xf32>,
    return
  }
  func.func @transform_0(%arg0: i32) -> (i32, i32) {
    %c0_i32 = arith.constant 0 : i32
    %c0_i32_0 = arith.constant 0 : i32
    return %arg0, %c0_i32 : i32, i32
  }
  func.func @transform_1(%arg0: i32) -> (i32, i32) {
    %c0_i32 = arith.constant 0 : i32
    %c0_i32_0 = arith.constant 0 : i32
    %c0_i32_1 = arith.constant 0 : i32
    return %c0_i32, %c0_i32_0 : i32, i32
  }
  func.func @transform_2(%arg0: i32) -> (i32, i32) {
    %c0_i32 = arith.constant 0 : i32
    %c0_i32_0 = arith.constant 0 : i32
    %c0_i32_1 = arith.constant 0 : i32
    return %c0_i32, %c0_i32_0 : i32, i32
  }
  func.func @transform_3(%arg0: i32) -> (i32, i32) {
    %c0_i32 = arith.constant 0 : i32
    %c0_i32_0 = arith.constant 0 : i32
    %c0_i32_1 = arith.constant 0 : i32
    return %c0_i32, %c0_i32_0 : i32, i32
  }
  func.func @transform_4(%arg0: i32) -> (i32, i32) {
    %c0_i32 = arith.constant 0 : i32
    %c0_i32_0 = arith.constant 0 : i32
    %c0_i32_1 = arith.constant 0 : i32
    return %c0_i32, %c0_i32_0 : i32, i32
  }
  func.func @transform_5(%arg0: i32) -> (i32, i32) {
    %c0_i32 = arith.constant 0 : i32
    %c0_i32_0 = arith.constant 0 : i32
    %c0_i32_1 = arith.constant 0 : i32
    return %c0_i32, %c0_i32_0 : i32, i32
  }
  func.func @transform_6(%arg0: i32) -> (i32, i32) {
    %c0_i32 = arith.constant 0 : i32
    %c0_i32_0 = arith.constant 0 : i32
    %c0_i32_1 = arith.constant 0 : i32
    return %c0_i32, %c0_i32_0 : i32, i32
  }
  func.func @transform_7(%arg0: i32) -> (i32, i32) {
    %c0_i32 = arith.constant 0 : i32
    %c0_i32_0 = arith.constant 0 : i32
    return %arg0, %c0_i32 : i32, i32
  }
}

</mosaic_0001>

<bundles_post_ra>
// kernel: mlp_forward.1
= control target key start
LH: loop header
LB: loop body
LE: loop exit
PB: predicated region body
PF: predicated region fallthrough
CT: control target
= control target key end

     0   :  { %12 = vsyncpa [#allocation3], 0  ;;  %s3454_s0 = inlined_call_operand.hbm [shape: f32[300,784], index: 0, kind: input, shape index: {}]   ;;  %s3455_s1 = inlined_call_operand.hbm [shape: bf16[784,128], index: 1, kind: input, shape index: {}]   ;;  %s3456_s2 = inlined_call_operand.hbm [shape: f32[1,128], index: 2, kind: input, shape index: {}]   ;;  %s3457_s3 = inlined_call_operand.hbm [shape: bf16[128,128], index: 3, kind: input, shape index: {}]   ;;  %s3458_s4 = inlined_call_operand.hbm [shape: f32[1,128], index: 4, kind: input, shape index: {}]   ;;  %s3459_s5 = inlined_call_operand.hbm [shape: bf16[128,128], index: 5, kind: input, shape index: {}]   ;;  %s3460_s6 = inlined_call_operand.hbm [shape: f32[1,128], index: 6, kind: input, shape index: {}]   ;;  %s3461_s7 = inlined_call_operand.vmem [shape: f32[300,128], index: 7, kind: output, shape index: {}]  }
   0x1   :  { %14 = vsyncpa [#allocation3 + $0x1], 0 }
   0x2   :  { %15 = vsyncpa [#allocation5], 0 }
   0x3   :  { %16 = vsyncpa [#allocation8], 0 }
   0x4   :  { %17 = vsyncpa [#allocation11], 0  ;;  %s2972_s24 = smov 0   ;;  %s2974_s25 = smov 0  }
   0x5   :  { %s2976_s26 = smov 0   ;;  %s2978_s27 = smov 0  }
   0x6 LB: > { %s2921_s28 = smov [#allocation4]   ;;  %s2032_s30 = sadd.s32 4294967295, %s2919_s27   ;;  %s2919_s27 = sphi %s2978_s27, %s3479_s27   ;;  %s2915_s26 = sphi %s2976_s26, %s3478_s26   ;;  %s2911_s25 = sphi %s2974_s25, %s3477_s25   ;;  %s2907_s24 = sphi %s2972_s24, %s3476_s24  }
   0x7   : > { %s218_s29 = sshll.u32 %s2921_s28, 4  ;;  %p2034_p0 = scmp.ge.s32.totalorder %s2919_s27, 1  ;;  %s219_s29 = int_to_ptr.vmem [resolvable:$true] %s218_s29 }
   0x8   : > { %p2996_p1 = scmp.eq.s32.totalorder %s2032_s30, 0  ;;  %p206_p2 = scmp.lt.s32.totalorder %s2919_s27, 3 }
   0x9   : > { %s2922_s11 = smov [#allocation7]   ;;  %s2923_s13 = smov [#allocation10]  }
   0xa   : > { %s3466_s8 = scalar_select %p2996_p1, 1, 0 }
   0xb   : > { %p3001_p3 = pnand %p2034_p0, %p206_p2  ;;  %s242_s12 = sshll.u32 %s2922_s11, 4  ;;  %s3013_s12 = int_to_ptr.vmem [resolvable:$true] %s242_s12 }
   0xc   : > { %s266_s14 = sshll.u32 %s2923_s13, 4  ;;  %s2700_s16 = scalar_lea.vmem %s219_s29, 6272  ;;  %s3015_s14 = int_to_ptr.vmem [resolvable:$true] %s266_s14 }
   0xd   : > { %s3467_s9 = scalar_select %p3001_p3, 1, 0 }
   0xe   : > { %p2545_p4 = pneg %p3001_p3  ;;  %p2701_p7 = scmp.ne.s32.totalorder %s219_s29, %s2700_s16 }
   0xf   : > { %p2708_p10 = scmp.lt.s32.totalorder %s219_s29, %s219_s29  ;;  %p2709_p11 = scmp.lt.s32.totalorder %s2700_s16, %s2700_s16 }
  0x10   : > { %p3009_p5 = pnand %p2545_p4, %p2996_p1 }
  0x11   : > { %p2710_p12 = por %p2709_p11, %p2708_p10 }
  0x12   : > { %p3019_p6 = pneg %p3009_p5 }
  0x14   : > { %p2703_p8 = pnand %p2701_p7, %p3019_p6 }
  0x16   : > { %p2704_p9 = pneg %p2703_p8 }
  0x18   : > { %p2711_p13 = pnand %p2710_p12, %p2704_p9 }
  0x1a   : > { %2714 = shalt.err (!%p2711_p13)
}
  0x1b   : > { %s2924_s17 = smov 64   ;;  %s2925_s18 = smov 4  }
  0x1c   : > { %2548 = dma.hbm_to_vmem [thread:$0]  (!%p3009_p5), %s3455_s1, 6272, %s219_s29, [#allocation5], %s2924_s17, %s2924_s17, %s2925_s18  }
  0x1d   : > { %s2726_s21 = scalar_lea.vmem %s3013_s12, 1024  ;;  %p2734_p7 = scmp.lt.s32.totalorder %s3013_s12, %s3013_s12 }
  0x1e   : > { %p2727_p0 = scmp.ne.s32.totalorder %s3013_s12, %s2726_s21  ;;  %p2735_p8 = scmp.lt.s32.totalorder %s2726_s21, %s2726_s21 }
  0x20   : > { %p2729_p2 = pnand %p2727_p0, %p3019_p6  ;;  %p2736_p9 = por %p2735_p8, %p2734_p7 }
  0x22   : > { %p2730_p4 = pneg %p2729_p2 }
  0x24   : > { %p2737_p10 = pnand %p2736_p9, %p2730_p4 }
  0x26   : > { %2740 = shalt.err (!%p2737_p10)
}
  0x27   : > { %2554 = dma.hbm_to_vmem [thread:$0]  (!%p3009_p5), %s3457_s3, 1024, %s3013_s12, [#allocation8], %s2924_s17, %s2924_s17, %s2925_s18  }
  0x28   : > { %s2752_s28 = scalar_lea.vmem %s3015_s14, 1024  ;;  %p2760_p0 = scmp.lt.s32.totalorder %s3015_s14, %s3015_s14 }
  0x29   : > { %p2753_p11 = scmp.ne.s32.totalorder %s3015_s14, %s2752_s28  ;;  %p2761_p2 = scmp.lt.s32.totalorder %s2752_s28, %s2752_s28 }
  0x2b   : > { %p2755_p12 = pnand %p2753_p11, %p3019_p6  ;;  %p2762_p4 = por %p2761_p2, %p2760_p0 }
  0x2d   : > { %p2756_p13 = pneg %p2755_p12 }
  0x2f   : > { %p2763_p7 = pnand %p2762_p4, %p2756_p13 }
  0x31   : > { %2766 = shalt.err (!%p2763_p7)
}
  0x32   : > { %2560 = dma.hbm_to_vmem [thread:$0]  (!%p3009_p5), %s3459_s5, 1024, %s3015_s14, [#allocation11], %s2924_s17, %s2924_s17, %s2925_s18  }
  0x33   : > { %s2926_s12 = smov [#allocation6]   ;;  %s2927_s16 = smov [#allocation9]  }
  0x34   : > { %s232_s13 = sshll.u32 %s2926_s12, 4  ;;  %s256_s19 = sshll.u32 %s2927_s16, 4  ;;  %s233_s13 = int_to_ptr.vmem [resolvable:$true] %s232_s13  ;;  %s257_s19 = int_to_ptr.vmem [resolvable:$true] %s256_s19 }
  0x35   : > { %s2778_s20 = scalar_lea.vmem %s233_s13, 16  ;;  %s2785_s21 = scalar_lea.vmem %s233_s13, 32 }
  0x36   : > { %p2779_p8 = scmp.ne.s32.totalorder %s233_s13, %s2778_s20  ;;  %p2786_p11 = scmp.lt.s32.totalorder %s233_s13, %s233_s13 }
  0x37   : > { %p2787_p12 = scmp.lt.s32.totalorder %s2785_s21, %s2778_s20 }
  0x38   : > { %p2781_p9 = pnand %p2779_p8, %p3019_p6 }
  0x39   : > { %p2788_p13 = por %p2787_p12, %p2786_p11 }
  0x3a   : > { %p2782_p10 = pneg %p2781_p9 }
  0x3c   : > { %p2789_p0 = pnand %p2788_p13, %p2782_p10 }
  0x3e   : > { %2792 = shalt.err (!%p2789_p0)
}
  0x3f   : > { %2551 = dma.hbm_to_vmem [thread:$0]  (!%p3009_p5), %s3456_s2, 16, %s233_s13, [#allocation5]  }
  0x40   : > { %s2804_s18 = scalar_lea.vmem %s257_s19, 16  ;;  %s2811_s22 = scalar_lea.vmem %s257_s19, 32 }
  0x41   : > { %p2805_p2 = scmp.ne.s32.totalorder %s257_s19, %s2804_s18  ;;  %p2812_p8 = scmp.lt.s32.totalorder %s257_s19, %s257_s19 }
  0x42   : > { %p2813_p9 = scmp.lt.s32.totalorder %s2811_s22, %s2804_s18 }
  0x43   : > { %p2807_p4 = pnand %p2805_p2, %p3019_p6 }
  0x44   : > { %p2814_p3 = por %p2813_p9, %p2812_p8 }
  0x45   : > { %p2808_p7 = pneg %p2807_p4 }
  0x47   : > { %p2815_p1 = pnand %p2814_p3, %p2808_p7 }
  0x49   : > { %2818 = shalt.err (!%p2815_p1)
}
  0x4a   : > { %2557 = dma.hbm_to_vmem [thread:$0]  (!%p3009_p5), %s3458_s4, 16, %s257_s19, [#allocation8]  }
  0x4b   : > { %s2928_s29 = smov [#allocation12]  }
  0x4c   : > { %s280_s11 = sshll.u32 %s2928_s29, 4  ;;  %s281_s11 = int_to_ptr.vmem [resolvable:$true] %s280_s11 }
  0x4d   : > { %s2830_s12 = scalar_lea.vmem %s281_s11, 16  ;;  %s2837_s13 = scalar_lea.vmem %s281_s11, 32 }
  0x4e   : > { %p2831_p10 = scmp.ne.s32.totalorder %s281_s11, %s2830_s12  ;;  %p2838_p13 = scmp.lt.s32.totalorder %s281_s11, %s281_s11 }
  0x4f   : > { %p2839_p0 = scmp.lt.s32.totalorder %s2837_s13, %s2830_s12 }
  0x50   : > { %p2833_p11 = pnand %p2831_p10, %p3019_p6 }
  0x51   : > { %p2840_p3 = por %p2839_p0, %p2838_p13 }
  0x52   : > { %p2834_p12 = pneg %p2833_p11 }
  0x54   : > { %p2841_p1 = pnand %p2840_p3, %p2834_p12 }
  0x56   : > { %2844 = shalt.err (!%p2841_p1)
}
  0x57   : > { %2563 = dma.hbm_to_vmem [thread:$0]  (!%p3009_p5), %s3460_s6, 16, %s281_s11, [#allocation11]  }
  0x58   : > { %s3076_s15 = sadd.s32 1, %s2919_s27   ;;  %s30_s19 = sadd.s32 1, %s2915_s26 }
  0x59   : > { %s27_s10 = ssub.s32 %s2919_s27, %s3076_s15  ;;  %p37_p2 = scmp.ne.s32.totalorder %s2915_s26, %s2911_s25 }
  0x5a   : > { %p28_p6 = scmp.eq.s32.totalorder %s27_s10, 0  ;;  %p38_p4 = scmp.eq.s32.totalorder %s2919_s27, 0 }
  0x5b   : > { %p43_p7 = scmp.ne.s32.totalorder %s2911_s25, %s2907_s24  ;;  %p3470_p9 = scmp.ne.s32.totalorder %s3466_s8, 0 }
  0x5c   : > { %s3087_s21 = scalar_select %p28_p6, %s2915_s26, %s30_s19  }
  0x5d   : > { %p39_p8 = por %p38_p4, %p37_p2  ;;  %p3091_p10 = por %p3470_p9, %p43_p7 }
  0x5e   : > { %p2574_p11 = scmp.lt.s32.totalorder %s2919_s27, 2  ;;  %s291_s17 = sand.u32 1, %s2915_s26  }
  0x5f   : > { %s3471_s14 = scalar_select %p3091_p10, 1, 0 }
  0x60   : > { %s2516_s18 = smul.u32 1064, %s291_s17  ;;  %p3098_p5 = pnand %p2574_p11, %p39_p8 }
  0x61   : > { %s2575_s22 = smul.u32 17024, %s2919_s27  ;;  %s3109_s13 = scalar_lea.sflag [#allocation3], %s291_s17 }
  0x62   : > { %s295_s11 = scalar_lea.vmem [#allocation2], %s2516_s18  ;;  %p2847_p13 = pneg %p3098_p5 }
  0x63   : > { %s3105_s24 = scalar_lea.hbm %s3454_s0, %s2575_s22  ;;  %s303_s12 = sshll.u32 %s295_s11, 4  ;;  %s3107_s12 = int_to_ptr.vmem [resolvable:$true] %s303_s12 }
  0x64   : > { %s2845_s16 = scalar_lea.hbm %s3105_s24, 17024  ;;  %s2850_s19 = scalar_lea.hbm %s3454_s0, 34048 }
  0x65   : > { %p2846_p12 = scmp.ne.s32.totalorder %s3105_s24, %s2845_s16  ;;  %p2851_p1 = scmp.lt.s32.totalorder %s3105_s24, %s3454_s0 }
  0x66   : > { %p2852_p6 = scmp.lt.s32.totalorder %s2850_s19, %s2845_s16 }
  0x67   : > { %p2848_p0 = pnand %p2847_p13, %p2846_p12 }
  0x68   : > { %p2853_p2 = por %p2852_p6, %p2851_p1 }
  0x69   : > { %p2849_p3 = pneg %p2848_p0 }
  0x6b   : > { %p2854_p4 = pnand %p2853_p2, %p2849_p3 }
  0x6d   : > { %2857 = shalt.err (!%p2854_p4)
}
  0x6e   : > { %s2858_s17 = scalar_lea.vmem %s3107_s12, 17024  ;;  %s2929_s18 = smov [#allocation2]  }
  0x6f   : > { %p2859_p7 = scmp.ne.s32.totalorder %s3107_s12, %s2858_s17  ;;  %s2863_s29 = sshll.u32 %s2929_s18, 4  ;;  %s2864_s29 = int_to_ptr.vmem [resolvable:$false] %s2863_s29 }
  0x70   : > { %s2865_s11 = scalar_lea.vmem %s2864_s29, 34048  ;;  %p2866_p11 = scmp.lt.s32.totalorder %s3107_s12, %s2864_s29 }
  0x71   : > { %p2861_p8 = pnand %p2859_p7, %p2847_p13  ;;  %p2867_p12 = scmp.lt.s32.totalorder %s2865_s11, %s2858_s17 }
  0x73   : > { %p2862_p9 = pneg %p2861_p8  ;;  %p2868_p0 = por %p2867_p12, %p2866_p11 }
  0x75   : > { %p2869_p10 = pnand %p2868_p0, %p2862_p9 }
  0x77   : > { %2872 = shalt.err (!%p2869_p10)
}
  0x78   : > { %s2930_s16 = smov 896   ;;  %s2931_s20 = smov 56  }
  0x79   : > { %2567 = dma.hbm_to_vmem [thread:$0]  (!%p3098_p5), %s3105_s24, 17024, %s3107_s12, %s3109_s13, %s2930_s16, %s2930_s16, %s2931_s20  }
  0x7a   : > { %p3473_p13 = scmp.ne.s32.totalorder %s3467_s9, 0 }
  0x7b   : > { %s317_s10 = sand.u32 (!%p3473_p13), 1, %s2911_s25   ;;  %p3474_p3 = scmp.ne.s32.totalorder (!%p3473_p13), %s3471_s14, 0 }
  0x7c   : > { %315 = sbr.rel (%p3473_p13) target bundleno = 932 (0x3a4), region = 48  ;;  %s318_s22 = scalar_lea.sflag (!%p3473_p13), [#allocation3], %s317_s10 }
  0x7d   : > { %s2518_s19 = smul.u32 (!%p3473_p13), 1064, %s317_s10 }
  0x7f   : > { %s3133_s28 = scalar_lea.vmem (!%p3473_p13), [#allocation2], %s2518_s19 }
  0x81   : > { %2890 = dma.done.wait (%p3474_p3), %s318_s22, 17024  }
  0x82   : > { %2892 = vsyncadd (%p3474_p3), %s318_s22, 4294950272  ;;  %p3475_p10 = scmp.ne.s32.totalorder %s3466_s8, 0 }
  0x84   : > { %2894 = dma.done.wait (%p3475_p10), [#allocation5], 6288  }
  0x85   : > { %2896 = vsyncadd (%p3475_p10), [#allocation5], 4294961008 }
  0x86   : > { %2898 = dma.done.wait (%p3475_p10), [#allocation8], 1040  }
  0x87   : > { %2900 = vsyncadd (%p3475_p10), [#allocation8], 4294966256 }
  0x88   : > { %2902 = dma.done.wait (%p3475_p10), [#allocation11], 1040  }
  0x89   : > { %2904 = vsyncadd (%p3475_p10), [#allocation11], 4294966256  ;;  %v2624_v0 = vld [vmem:[#allocation4 + $0x78] sm:$0xff]   ;;  %v2628_v4 = vld [vmem:[#allocation4 + $0x70] sm:$0xff]   ;;  %vm986_vm0 = vcmask 130048   ;;  %s377_s8 = smul.u32 19, %s2032_s30 }
  0x8a   : > { %v2625_v1 = vld [vmem:[#allocation4 + $0xf8] sm:$0xff]   ;;  %2131 = vmatprep.subr.bf16.mxu0 %v2624_v0  ;;  %v2629_v5 = vld [vmem:[#allocation4 + $0xf0] sm:$0xff]   ;;  %v2632_v8 = vld [vmem:[#allocation4 + $0x68] sm:$0xff]  }
  0x8b   : > { %v2626_v2 = vld [vmem:[#allocation4 + $0x38] sm:$0xff]   ;;  %2207 = vmatprep.subr.bf16.mxu1 %v2625_v1  ;;  %v2630_v6 = vld [vmem:[#allocation4 + $0x30] sm:$0xff]   ;;  %v2633_v9 = vld [vmem:[#allocation4 + $0xe8] sm:$0xff]   ;;  %p378_p5 = scmp.lt.s32.totalorder %s377_s8, 37 }
  0x8c   : > { %v2627_v3 = vld [vmem:[#allocation4 + $0xb8] sm:$0xff]   ;;  %2132 = vmatpush3.bf16.msra.mxu0 %v2626_v2  ;;  %v2631_v7 = vld [vmem:[#allocation4 + $0xb0] sm:$0xff]   ;;  %v2634_v10 = vld [vmem:[#allocation4 + $0x28] sm:$0xff]  }
  0x8d   : > { %2208 = vmatpush3.bf16.msra.mxu1 %v2627_v3  ;;  %2133 = vmatprep.subr.bf16.mxu0 %v2628_v4  ;;  %v2635_v11 = vld [vmem:[#allocation4 + $0xa8] sm:$0xff]   ;;  %v2636_v12 = vld [vmem:[#allocation4 + $0x60] sm:$0xff]   ;;  %v2640_v16 = vld [vmem:[#allocation4 + $0x58] sm:$0xff]   ;;  %s3481_s8 = smov (!%p378_p5, %s377_s8), 37 }
  0x8e   : > { %2209 = vmatprep.subr.bf16.mxu1 %v2629_v5  ;;  %v2637_v13 = vld [vmem:[#allocation4 + $0xe0] sm:$0xff]   ;;  %v2641_v17 = vld [vmem:[#allocation4 + $0xd8] sm:$0xff]   ;;  %v2644_v20 = vld [vmem:[#allocation4 + $0x50] sm:$0xff]   ;;  %s2050_s9 = sshll.u32 %s3481_s8, 3 }
  0x8f   : > { %v2638_v14 = vld [vmem:[#allocation4 + $0x20] sm:$0xff]   ;;  %v2642_v18 = vld [vmem:[#allocation4 + $0x18] sm:$0xff]   ;;  %v2645_v21 = vld [vmem:[#allocation4 + $0xd0] sm:$0xff]   ;;  %s3420_s24 = scalar_lea.vmem %s3461_s7, %s2050_s9 }
  0x90   : > { %2134 = vmatpush3.bf16.msra.mxu0 %v2630_v6  ;;  %v2639_v15 = vld [vmem:[#allocation4 + $0xa0] sm:$0xff]   ;;  %v2643_v19 = vld [vmem:[#allocation4 + $0x98] sm:$0xff]   ;;  %v2646_v22 = vld [vmem:[#allocation4 + $0x10] sm:$0xff]  }
  0x91   : > { %2210 = vmatpush3.bf16.msra.mxu1 %v2631_v7  ;;  %2135 = vmatprep.subr.bf16.mxu0 %v2632_v8  ;;  %v2647_v23 = vld [vmem:[#allocation4 + $0x90] sm:$0xff]   ;;  %v2648_v24 = vld [vmem:[#allocation4 + $0x48] sm:$0xff]   ;;  %v2652_v28 = vld [vmem:[#allocation4 + $0x40] sm:$0xff]  }
  0x92   : > { %2211 = vmatprep.subr.bf16.mxu1 %v2633_v9  ;;  %v2649_v25 = vld [vmem:[#allocation4 + $0xc8] sm:$0xff]   ;;  %v2653_v29 = vld [vmem:[#allocation4 + $0xc0] sm:$0xff]   ;;  %v392_v33 = vld [vmem:[%s3133_s28 + $0x40] sm:$0xff] }
  0x93   : > { %v2650_v26 = vld [vmem:[#allocation4 + $0x8] sm:$0xff]   ;;  %v2654_v30 = vld [vmem:[#allocation4] sm:$0xff]   ;;  %v384_v37 = vld [vmem:[%s3133_s28] sm:$0xff] }
  0x94   : > { %2136 = vmatpush3.bf16.msra.mxu0 %v2634_v10  ;;  %v2651_v27 = vld [vmem:[#allocation4 + $0x88] sm:$0xff]   ;;  %v2655_v31 = vld [vmem:[#allocation4 + $0x80] sm:$0xff]   ;;  %v2656_v44 = vld [vmem:[#allocation4 + $0x178] sm:$0xff]  }
  0x95   : > { %2212 = vmatpush3.bf16.msra.mxu1 %v2635_v11  ;;  %2137 = vmatprep.subr.bf16.mxu0 %v2636_v12  ;;  %v385_v32 = vld [vmem:[%s3133_s28 + $0x8] sm:$0xff]  ;;  %v387_v34 = vld [vmem:[%s3133_s28 + $0x18] sm:$0xff]  ;;  %v394_v36 = vld [vmem:[%s3133_s28 + $0x50] sm:$0xff] }
  0x96   : > { %2213 = vmatprep.subr.bf16.mxu1 %v2637_v13  ;;  %v518_v35 = vpack.c.bf16 %v392_v33, %v385_v32  ;;  %v391_v38 = vld [vmem:[%s3133_s28 + $0x38] sm:$0xff]  ;;  %v520_v39 = vpack.c.bf16 %v394_v36, %v387_v34  ;;  %v386_v41 = vld [vmem:[%s3133_s28 + $0x10] sm:$0xff]  ;;  %v393_v42 = vld [vmem:[%s3133_s28 + $0x48] sm:$0xff] }
  0x97   : > { %v517_v40 = vpack.c.bf16 %v391_v38, %v384_v37  ;;  %v519_v43 = vpack.c.bf16 %v393_v42, %v386_v41  ;;  %v2657_v45 = vld [vmem:[#allocation4 + $0x138] sm:$0xff]   ;;  %v399_v46 = vld [vmem:[%s3133_s28 + $0x78] sm:$0xff]  ;;  %v406_v47 = vld [vmem:[%s3133_s28 + $0xb0] sm:$0xff] }
  0x98   : > { %2138 = vmatpush3.bf16.msra.mxu0 %v2638_v14  ;;  %1049 = vmatprep.mubr.bf16.mxu0 %v518_v35  ;;  %v401_v48 = vld [vmem:[%s3133_s28 + $0x88] sm:$0xff]  ;;  %v408_v49 = vld [vmem:[%s3133_s28 + $0xc0] sm:$0xff]  ;;  %v525_v50 = vpack.c.bf16 %v406_v47, %v399_v46  ;;  %v398_v52 = vld [vmem:[%s3133_s28 + $0x70] sm:$0xff] }
  0x99   : > { %2214 = vmatpush3.bf16.msra.mxu1 %v2639_v15  ;;  %2139 = vmatprep.subr.bf16.mxu0 %v2640_v16  ;;  %v527_v51 = vpack.c.bf16 %v408_v49, %v401_v48  ;;  %v405_v53 = vld [vmem:[%s3133_s28 + $0xa8] sm:$0xff]  ;;  %v400_v54 = vld [vmem:[%s3133_s28 + $0x80] sm:$0xff]  ;;  %v407_v55 = vld [vmem:[%s3133_s28 + $0xb8] sm:$0xff] }
  0x9a   : > { %2215 = vmatprep.subr.bf16.mxu1 %v2641_v17  ;;  %1161 = vmatprep.mubr.bf16.mxu1 %v520_v39  ;;  %v524_v56 = vpack.c.bf16 %v405_v53, %v398_v52  ;;  %v2658_v57 = vld [vmem:[#allocation4 + $0x170] sm:$0xff]   ;;  %v526_v58 = vpack.c.bf16 %v407_v55, %v400_v54  ;;  %v413_v60 = vld [vmem:[%s3133_s28 + $0xe8] sm:$0xff]  ;;  %v422_v0 = vld [vmem:[%s3133_s28 + $0x130] sm:$0xff] }
  0x9b   : > { %v2659_v59 = vld [vmem:[#allocation4 + $0x130] sm:$0xff]   ;;  %v414_v4 = vld [vmem:[%s3133_s28 + $0xf0] sm:$0xff]  ;;  %v421_v7 = vld [vmem:[%s3133_s28 + $0x128] sm:$0xff] }
  0x9c   : > { %2140 = vmatpush3.bf16.msra.mxu0 %v2642_v18  ;;  %v420_v61 = vld [vmem:[%s3133_s28 + $0x120] sm:$0xff]  ;;  %v415_v63 = vld [vmem:[%s3133_s28 + $0xf8] sm:$0xff]  ;;  %v434_v9 = vld [vmem:[%s3133_s28 + $0x190] sm:$0xff]  ;;  %v533_v13 = vpack.c.bf16 %v421_v7, %v414_v4 }
  0x9d   : > { %2216 = vmatpush3.bf16.msra.mxu1 %v2643_v19  ;;  %2141 = vmatprep.subr.bf16.mxu0 %v2644_v20  ;;  %v532_v62 = vpack.c.bf16 %v420_v61, %v413_v60  ;;  %v534_v1 = vpack.c.bf16 %v422_v0, %v415_v63  ;;  %v412_v2 = vld [vmem:[%s3133_s28 + $0xe0] sm:$0xff]  ;;  %v419_v3 = vld [vmem:[%s3133_s28 + $0x118] sm:$0xff]  ;;  %v429_v10 = vld [vmem:[%s3133_s28 + $0x168] sm:$0xff] }
  0x9e   : > { %2217 = vmatprep.subr.bf16.mxu1 %v2645_v21  ;;  %v2660_v5 = vld [vmem:[#allocation4 + $0x168] sm:$0xff]   ;;  %v436_v11 = vld [vmem:[%s3133_s28 + $0x1a0] sm:$0xff]  ;;  %v531_v12 = vpack.c.bf16 %v419_v3, %v412_v2  ;;  %v2662_v15 = vld [vmem:[#allocation4 + $0x160] sm:$0xff]  }
  0x9f   : > { %v2661_v6 = vld [vmem:[#allocation4 + $0x128] sm:$0xff]   ;;  %v541_v16 = vpack.c.bf16 %v436_v11, %v429_v10  ;;  %v2663_v17 = vld [vmem:[#allocation4 + $0x120] sm:$0xff]   ;;  %v428_v20 = vld [vmem:[%s3133_s28 + $0x160] sm:$0xff] }
  0xa0   : > { %2142 = vmatpush3.bf16.msra.mxu0 %v2646_v22  ;;  %v427_v8 = vld [vmem:[%s3133_s28 + $0x158] sm:$0xff]  ;;  %v426_v18 = vld [vmem:[%s3133_s28 + $0x150] sm:$0xff]  ;;  %v433_v19 = vld [vmem:[%s3133_s28 + $0x188] sm:$0xff] }
  0xa1   : > { %2218 = vmatpush3.bf16.msra.mxu1 %v2647_v23  ;;  %2143 = vmatprep.subr.bf16.mxu0 %v2648_v24  ;;  %v539_v14 = vpack.c.bf16 %v434_v9, %v427_v8  ;;  %v435_v21 = vld [vmem:[%s3133_s28 + $0x198] sm:$0xff]  ;;  %v441_v22 = vld [vmem:[%s3133_s28 + $0x1c8] sm:$0xff]  ;;  %v448_v23 = vld [vmem:[%s3133_s28 + $0x200] sm:$0xff] }
  0xa2   : > { %2219 = vmatprep.subr.bf16.mxu1 %v2649_v25  ;;  %v443_v24 = vld [vmem:[%s3133_s28 + $0x1d8] sm:$0xff]  ;;  %v450_v25 = vld [vmem:[%s3133_s28 + $0x210] sm:$0xff]  ;;  %v440_v32 = vld [vmem:[%s3133_s28 + $0x1c0] sm:$0xff] }
  0xa3   : > { %v447_v33 = vld [vmem:[%s3133_s28 + $0x1f8] sm:$0xff]  ;;  %v442_v34 = vld [vmem:[%s3133_s28 + $0x1d0] sm:$0xff]  ;;  %v449_v35 = vld [vmem:[%s3133_s28 + $0x208] sm:$0xff] }
  0xa4   : > { %2144 = vmatpush3.bf16.msra.mxu0 %v2650_v26  ;;  %v538_v26 = vpack.c.bf16 %v433_v19, %v426_v18  ;;  %v455_v36 = vld [vmem:[%s3133_s28 + $0x238] sm:$0xff]  ;;  %v462_v38 = vld [vmem:[%s3133_s28 + $0x270] sm:$0xff]  ;;  %v464_v41 = vld [vmem:[%s3133_s28 + $0x280] sm:$0xff]  ;;  %v545_v42 = vpack.c.bf16 %v447_v33, %v440_v32 }
  0xa5   : > { %2220 = vmatpush3.bf16.msra.mxu1 %v2651_v27  ;;  %2145 = vmatprep.subr.bf16.mxu0 %v2652_v28  ;;  %v2664_v27 = vld [vmem:[#allocation4 + $0x158] sm:$0xff]   ;;  %v540_v28 = vpack.c.bf16 %v435_v21, %v428_v20  ;;  %v2666_v37 = vld [vmem:[#allocation4 + $0x150] sm:$0xff]   ;;  %v2668_v46 = vld [vmem:[#allocation4 + $0x148] sm:$0xff]  }
  0xa6   : > { %2221 = vmatprep.subr.bf16.mxu1 %v2653_v29  ;;  %v546_v29 = vpack.c.bf16 %v448_v23, %v441_v22  ;;  %v2667_v39 = vld [vmem:[#allocation4 + $0x110] sm:$0xff]   ;;  %v2669_v47 = vld [vmem:[#allocation4 + $0x108] sm:$0xff]   ;;  %v461_v49 = vld [vmem:[%s3133_s28 + $0x268] sm:$0xff] }
  0xa7   : > { %v454_v48 = vld [vmem:[%s3133_s28 + $0x230] sm:$0xff]  ;;  %v469_v52 = vld [vmem:[%s3133_s28 + $0x2a8] sm:$0xff]  ;;  %v476_v53 = vld [vmem:[%s3133_s28 + $0x2e0] sm:$0xff] }
  0xa8   : > { %2146 = vmatpush3.bf16.msra.mxu0 %v2654_v30  ;;  %v2665_v30 = vld [vmem:[#allocation4 + $0x118] sm:$0xff]   ;;  %v2670_v54 = vld [vmem:[#allocation4 + $0x140] sm:$0xff]   ;;  %v471_v55 = vld [vmem:[%s3133_s28 + $0x2b8] sm:$0xff]  ;;  %v560_v60 = vpack.c.bf16 %v476_v53, %v469_v52 }
  0xa9   : > { %2222 = vmatpush3.bf16.msra.mxu1 %v2655_v31  ;;  %2283 = vmatprep.subr.bf16.mxu0 %v2656_v44  ;;  %v548_v31 = vpack.c.bf16 %v450_v25, %v443_v24  ;;  %v475_v63 = vld [vmem:[%s3133_s28 + $0x2d8] sm:$0xff]  ;;  %v470_v0 = vld [vmem:[%s3133_s28 + $0x2b0] sm:$0xff]  ;;  %v496_v23 = vld [vmem:[%s3133_s28 + $0x380] sm:$0xff] }
  0xaa   : > { %2500 = vmatprep.subr.bf16.mxu1 %v2656_v44  ;;  %v553_v44 = vpack.c.bf16 %v462_v38, %v455_v36  ;;  %v483_v2 = vld [vmem:[%s3133_s28 + $0x318] sm:$0xff]  ;;  %v490_v3 = vld [vmem:[%s3133_s28 + $0x350] sm:$0xff]  ;;  %v396_v36 = vld [vmem:[%s3133_s28 + $0x60] sm:$0xff] }
  0xab   : > { %1050 = vmatmul.mubr.bf16.vlgmr.msra.gmra.mxu0 %v517_v40  ;;  %v457_v40 = vld [vmem:[%s3133_s28 + $0x248] sm:$0xff]  ;;  %v567_v9 = vpack.c.bf16 %v490_v3, %v483_v2  ;;  %v482_v11 = vld [vmem:[%s3133_s28 + $0x310] sm:$0xff]  ;;  %v503_v24 = vld [vmem:[%s3133_s28 + $0x3b8] sm:$0xff] }
  0xac   : > { %1162 = vmatmul.mubr.bf16.vlgmr.msra.gmra.mxu1 %v519_v43  ;;  %2284 = vmatpush3.bf16.msra.mxu0 %v2657_v45  ;;  %v547_v43 = vpack.c.bf16 %v449_v35, %v442_v34  ;;  %v3209_v4 = vld [vmem:[#allocation4 + $0x180] sm:$0xff]   ;;  %v512_v34 = vld [vmem:[%s3133_s28 + $0x400] sm:$0xff]  ;;  %v423_v2 = vld [vmem:[%s3133_s28 + $0x138] sm:$0xff] }
  0xad   : > { %2508 = vmatpush3.bf16.msra.mxu1 %v2657_v45  ;;  %1057 = vmatprep.mubr.bf16.mxu0 %v525_v50  ;;  %v555_v45 = vpack.c.bf16 %v464_v41, %v457_v40  ;;  %v456_v50 = vld [vmem:[%s3133_s28 + $0x240] sm:$0xff]  ;;  %v506_v18 = vld [vmem:[%s3133_s28 + $0x3d0] sm:$0xff]  ;;  %v389_v35 = vld [vmem:[%s3133_s28 + $0x28] sm:$0xff]  ;;  %v582_v40 = vpack.c.bf16 %v512_v34, %v512_v34 }
  0xae   : > { %1169 = vmatprep.mubr.bf16.mxu1 %v527_v51  ;;  %2285 = vmatprep.subr.bf16.mxu0 %v2658_v57  ;;  %v463_v51 = vld [vmem:[%s3133_s28 + $0x278] sm:$0xff]  ;;  %v498_v25 = vld [vmem:[%s3133_s28 + $0x390] sm:$0xff]  ;;  %v508_v38 = vld [vmem:[%s3133_s28 + $0x3e0] sm:$0xff]  ;;  %v522_v41 = vpack.c.bf16 %v396_v36, %v389_v35 }
  0xaf   : > { %2501 = vmatprep.subr.bf16.mxu1 %v2658_v57  ;;  %v552_v57 = vpack.c.bf16 %v461_v49, %v454_v48  ;;  %v510_v33 = vld [vmem:[%s3133_s28 + $0x3f0] sm:$0xff]  ;;  %v515_v49 = vld [vmem:[%s3133_s28 + $0x418] sm:$0xff]  ;;  %v404_v3 = vld [vmem:[%s3133_s28 + $0xa0] sm:$0xff] }
  0xb0   : > { %2286 = vmatpush3.bf16.msra.mxu0 %v2659_v59  ;;  %v410_v48 = vld [vmem:[%s3133_s28 + $0xd0] sm:$0xff]  ;;  %v585_v53 = vpack.c.bf16 %v515_v49, %v515_v49  ;;  %v472_v49 = vld [vmem:[%s3133_s28 + $0x2c0] sm:$0xff] }
  0xb1   : > { %2509 = vmatpush3.bf16.msra.mxu1 %v2659_v59  ;;  %2287 = vmatprep.subr.bf16.mxu0 %v2660_v5  ;;  %v554_v59 = vpack.c.bf16 %v463_v51, %v456_v50 }
  0xb2   : > { %2502 = vmatprep.subr.bf16.mxu1 %v2660_v5  ;;  %v485_v5 = vld [vmem:[%s3133_s28 + $0x328] sm:$0xff] }
  0xb3   : > { %1058 = vmatmul.mubr.bf16.gmra.mxu0 %v524_v56  ;;  %v478_v56 = vld [vmem:[%s3133_s28 + $0x2f0] sm:$0xff] }
  0xb4   : > { %1170 = vmatmul.mubr.bf16.gmra.mxu1 %v526_v58  ;;  %1065 = vmatprep.mubr.bf16.mxu0 %v532_v62  ;;  %v2671_v58 = vld [vmem:[#allocation4 + $0x100] sm:$0xff]   ;;  %v562_v61 = vpack.c.bf16 %v478_v56, %v471_v55  ;;  %v468_v62 = vld [vmem:[%s3133_s28 + $0x2a0] sm:$0xff] }
  0xb5   : > { %1177 = vmatprep.mubr.bf16.mxu1 %v534_v1  ;;  %2288 = vmatpush3.bf16.msra.mxu0 %v2661_v6  ;;  %v477_v1 = vld [vmem:[%s3133_s28 + $0x2e8] sm:$0xff]  ;;  %v559_v7 = vpack.c.bf16 %v475_v63, %v468_v62  ;;  %v514_v56 = vld [vmem:[%s3133_s28 + $0x410] sm:$0xff] }
  0xb6   : > { %2510 = vmatpush3.bf16.msra.mxu1 %v2661_v6  ;;  %2289 = vmatprep.subr.bf16.mxu0 %v2662_v15  ;;  %v492_v6 = vld [vmem:[%s3133_s28 + $0x360] sm:$0xff]  ;;  %v561_v8 = vpack.c.bf16 %v477_v1, %v470_v0  ;;  %v409_v55 = vld [vmem:[%s3133_s28 + $0xc8] sm:$0xff]  ;;  %v584_v62 = vpack.c.bf16 %v514_v56, %v514_v56 }
  0xb7   : > { %2503 = vmatprep.subr.bf16.mxu1 %v2662_v15  ;;  %v569_v10 = vpack.c.bf16 %v492_v6, %v485_v5  ;;  %v497_v15 = vld [vmem:[%s3133_s28 + $0x388] sm:$0xff]  ;;  %v416_v1 = vld [vmem:[%s3133_s28 + $0x100] sm:$0xff]  ;;  %v431_v5 = vld [vmem:[%s3133_s28 + $0x178] sm:$0xff] }
  0xb8   : > { %v438_v6 = vld [vmem:[%s3133_s28 + $0x1b0] sm:$0xff] }
  0xb9   : > { %2290 = vmatpush3.bf16.msra.mxu0 %v2663_v17 }
  0xba   : > { %2511 = vmatpush3.bf16.msra.mxu1 %v2663_v17  ;;  %2291 = vmatprep.subr.bf16.mxu0 %v2664_v27  ;;  %v499_v17 = vld [vmem:[%s3133_s28 + $0x398] sm:$0xff] }
  0xbb   : > { %1066 = vmatmul.mubr.bf16.gmra.mxu0 %v531_v12  ;;  %2504 = vmatprep.subr.bf16.mxu1 %v2664_v27  ;;  %v489_v12 = vld [vmem:[%s3133_s28 + $0x348] sm:$0xff]  ;;  %v576_v22 = vpack.c.bf16 %v506_v18, %v499_v17  ;;  %v511_v27 = vld [vmem:[%s3133_s28 + $0x3f8] sm:$0xff]  ;;  %v452_v18 = vld [vmem:[%s3133_s28 + $0x220] sm:$0xff] }
  0xbc   : > { %1178 = vmatmul.mubr.bf16.gmra.mxu1 %v533_v13  ;;  %1073 = vmatprep.mubr.bf16.mxu0 %v539_v14  ;;  %v484_v13 = vld [vmem:[%s3133_s28 + $0x320] sm:$0xff]  ;;  %v491_v14 = vld [vmem:[%s3133_s28 + $0x358] sm:$0xff]  ;;  %v566_v19 = vpack.c.bf16 %v489_v12, %v482_v11  ;;  %v543_v11 = vpack.c.bf16 %v438_v6, %v431_v5  ;;  %v445_v17 = vld [vmem:[%s3133_s28 + $0x1e8] sm:$0xff] }
  0xbd   : > { %1185 = vmatprep.mubr.bf16.mxu1 %v541_v16  ;;  %2292 = vmatpush3.bf16.msra.mxu0 %v2665_v30  ;;  %v504_v16 = vld [vmem:[%s3133_s28 + $0x3c0] sm:$0xff]  ;;  %v568_v20 = vpack.c.bf16 %v491_v14, %v484_v13  ;;  %v430_v13 = vld [vmem:[%s3133_s28 + $0x170] sm:$0xff]  ;;  %v437_v14 = vld [vmem:[%s3133_s28 + $0x1a8] sm:$0xff] }
  0xbe   : > { %2512 = vmatpush3.bf16.msra.mxu1 %v2665_v30  ;;  %2293 = vmatprep.subr.bf16.mxu0 %v2666_v37  ;;  %v574_v21 = vpack.c.bf16 %v504_v16, %v497_v15  ;;  %v432_v15 = vld [vmem:[%s3133_s28 + $0x180] sm:$0xff]  ;;  %v439_v16 = vld [vmem:[%s3133_s28 + $0x1b8] sm:$0xff] }
  0xbf   : > { %2505 = vmatprep.subr.bf16.mxu1 %v2666_v37  ;;  %v501_v37 = vld [vmem:[%s3133_s28 + $0x3a8] sm:$0xff]  ;;  %v3298_v6 = vld [vmem:[#allocation6] ss:$0 sm:$0xff] }
  0xc1   : > { %2294 = vmatpush3.bf16.msra.mxu0 %v2667_v39 }
  0xc2   : > { %2513 = vmatpush3.bf16.msra.mxu1 %v2667_v39  ;;  %2295 = vmatprep.subr.bf16.mxu0 %v2668_v46  ;;  %v580_v39 = vpack.c.bf16 %v510_v33, %v510_v33 }
  0xc3   : > { %1074 = vmatmul.mubr.bf16.gmra.mxu0 %v538_v26  ;;  %2506 = vmatprep.subr.bf16.mxu1 %v2668_v46  ;;  %v505_v26 = vld [vmem:[%s3133_s28 + $0x3c8] sm:$0xff]  ;;  %v507_v46 = vld [vmem:[%s3133_s28 + $0x3d8] sm:$0xff] }
  0xc4   : > { %1186 = vmatmul.mubr.bf16.gmra.mxu1 %v540_v28  ;;  %1081 = vmatprep.mubr.bf16.mxu0 %v546_v29  ;;  %v513_v28 = vld [vmem:[%s3133_s28 + $0x408] sm:$0xff]  ;;  %v573_v29 = vpack.c.bf16 %v503_v24, %v496_v23  ;;  %v575_v30 = vpack.c.bf16 %v505_v26, %v498_v25  ;;  %v550_v23 = vpack.c.bf16 %v452_v18, %v445_v17  ;;  %v444_v25 = vld [vmem:[%s3133_s28 + $0x1e0] sm:$0xff]  ;;  %v451_v26 = vld [vmem:[%s3133_s28 + $0x218] sm:$0xff] }
  0xc5   : > { %1193 = vmatprep.mubr.bf16.mxu1 %v548_v31  ;;  %2296 = vmatpush3.bf16.msra.mxu0 %v2669_v47  ;;  %v581_v31 = vpack.c.bf16 %v511_v27, %v511_v27  ;;  %v583_v32 = vpack.c.bf16 %v513_v28, %v513_v28  ;;  %v460_v27 = vld [vmem:[%s3133_s28 + $0x260] sm:$0xff]  ;;  %v467_v28 = vld [vmem:[%s3133_s28 + $0x298] sm:$0xff]  ;;  %v549_v33 = vpack.c.bf16 %v451_v26, %v444_v25 }
  0xc6   : > { %2297 = vmatprep.subr.bf16.mxu0 %v2670_v54  ;;  %2514 = vmatpush3.bf16.msra.mxu1 %v2669_v47  ;;  %v403_v47 = vld [vmem:[%s3133_s28 + $0x98] sm:$0xff]  ;;  %v558_v34 = vpack.c.bf16 %v467_v28, %v460_v27 }
  0xc7   : > { %2507 = vmatprep.subr.bf16.mxu1 %v2670_v54  ;;  %v529_v52 = vpack.c.bf16 %v410_v48, %v403_v47  ;;  %v402_v54 = vld [vmem:[%s3133_s28 + $0x90] sm:$0xff] }
  0xc9   : > { %2298 = vmatpush3.bf16.msra.mxu0 %v2671_v58 }
  0xca   : > { %2515 = vmatpush3.bf16.msra.mxu1 %v2671_v58  ;;  %v424_v58 = vld [vmem:[%s3133_s28 + $0x140] sm:$0xff] }
  0xcb   : > { %1082 = vmatmul.mubr.bf16.gmra.mxu0 %v545_v42  ;;  %2406 = vmatprep.subr.bf16.mxu1 %v3209_v4  ;;  %v578_v42 = vpack.c.bf16 %v508_v38, %v501_v37  ;;  %v458_v37 = vld [vmem:[%s3133_s28 + $0x250] sm:$0xff]  ;;  %v465_v38 = vld [vmem:[%s3133_s28 + $0x288] sm:$0xff] }
  0xcc   : > { %1194 = vmatmul.mubr.bf16.gmra.mxu1 %v547_v43  ;;  %1089 = vmatprep.mubr.bf16.mxu0 %v553_v44  ;;  %v388_v43 = vld [vmem:[%s3133_s28 + $0x20] sm:$0xff]  ;;  %v395_v44 = vld [vmem:[%s3133_s28 + $0x58] sm:$0xff] }
  0xcd   : > { %1201 = vmatprep.mubr.bf16.mxu1 %v555_v45  ;;  %v500_v45 = vld [vmem:[%s3133_s28 + $0x3a0] sm:$0xff]  ;;  %v521_v50 = vpack.c.bf16 %v395_v44, %v388_v43  ;;  %v502_v43 = vld [vmem:[%s3133_s28 + $0x3b0] sm:$0xff]  ;;  %v509_v44 = vld [vmem:[%s3133_s28 + $0x3e8] sm:$0xff] }
  0xce   : > { %v577_v51 = vpack.c.bf16 %v507_v46, %v500_v45  ;;  %v556_v45 = vpack.c.bf16 %v465_v38, %v458_v37  ;;  %v579_v48 = vpack.c.bf16 %v509_v44, %v502_v43 }
  0xd3   : > { %1090 = vmatmul.mubr.bf16.gmra.mxu0 %v552_v57  ;;  %v417_v57 = vld [vmem:[%s3133_s28 + $0x108] sm:$0xff] }
  0xd4   : > { %1202 = vmatmul.mubr.bf16.gmra.mxu1 %v554_v59  ;;  %1097 = vmatprep.mubr.bf16.mxu0 %v560_v60  ;;  %v390_v59 = vld [vmem:[%s3133_s28 + $0x30] sm:$0xff]  ;;  %v397_v60 = vld [vmem:[%s3133_s28 + $0x68] sm:$0xff]  ;;  %v536_v63 = vpack.c.bf16 %v424_v58, %v417_v57 }
  0xd5   : > { %1209 = vmatprep.mubr.bf16.mxu1 %v562_v61  ;;  %v528_v61 = vpack.c.bf16 %v409_v55, %v402_v54  ;;  %v523_v0 = vpack.c.bf16 %v397_v60, %v390_v59  ;;  %v486_v57 = vld [vmem:[%s3133_s28 + $0x330] sm:$0xff]  ;;  %v493_v58 = vld [vmem:[%s3133_s28 + $0x368] sm:$0xff] }
  0xd6   : > { %v570_v59 = vpack.c.bf16 %v493_v58, %v486_v57  ;;  %v2673_v60 = vld [vmem:[#allocation7 + $0x38] sm:$0xff]  }
  0xdb   : > { %1098 = vmatmul.mubr.bf16.gmra.mxu0 %v559_v7  ;;  %v418_v7 = vld [vmem:[%s3133_s28 + $0x110] sm:$0xff] }
  0xdc   : > { %1210 = vmatmul.mubr.bf16.gmra.mxu1 %v561_v8  ;;  %1105 = vmatprep.mubr.bf16.mxu0 %v567_v9  ;;  %v425_v8 = vld [vmem:[%s3133_s28 + $0x148] sm:$0xff]  ;;  %v535_v9 = vpack.c.bf16 %v423_v2, %v416_v1 }
  0xdd   : > { %1217 = vmatprep.mubr.bf16.mxu1 %v569_v10  ;;  %v537_v12 = vpack.c.bf16 %v425_v8, %v418_v7  ;;  %v2678_v1 = vld [vmem:[#allocation7 + $0x10] sm:$0xff]   ;;  %v2679_v2 = vld [vmem:[#allocation7 + $0x8] sm:$0xff]  }
  0xe3   : > { %1106 = vmatmul.mubr.bf16.gmra.mxu0 %v566_v19  ;;  %v446_v19 = vld [vmem:[%s3133_s28 + $0x1f0] sm:$0xff] }
  0xe4   : > { %1218 = vmatmul.mubr.bf16.gmra.mxu1 %v568_v20  ;;  %1113 = vmatprep.mubr.bf16.mxu0 %v574_v21  ;;  %v453_v20 = vld [vmem:[%s3133_s28 + $0x228] sm:$0xff]  ;;  %v542_v21 = vpack.c.bf16 %v437_v14, %v430_v13 }
  0xe5   : > { %1225 = vmatprep.mubr.bf16.mxu1 %v576_v22  ;;  %v544_v22 = vpack.c.bf16 %v439_v16, %v432_v15  ;;  %v551_v24 = vpack.c.bf16 %v453_v20, %v446_v19 }
  0xeb   : > { %1114 = vmatmul.mubr.bf16.gmra.mxu0 %v573_v29  ;;  %v459_v29 = vld [vmem:[%s3133_s28 + $0x258] sm:$0xff] }
  0xec   : > { %1226 = vmatmul.mubr.bf16.gmra.mxu1 %v575_v30  ;;  %1121 = vmatprep.mubr.bf16.mxu0 %v581_v31  ;;  %v466_v30 = vld [vmem:[%s3133_s28 + $0x290] sm:$0xff] }
  0xed   : > { %1233 = vmatprep.mubr.bf16.mxu1 %v583_v32  ;;  %v474_v31 = vld [vmem:[%s3133_s28 + $0x2d0] sm:$0xff]  ;;  %v481_v32 = vld [vmem:[%s3133_s28 + $0x308] sm:$0xff]  ;;  %v557_v35 = vpack.c.bf16 %v466_v30, %v459_v29 }
  0xee   : > { %v565_v36 = vpack.c.bf16 %v481_v32, %v474_v31 }
  0xf3   : > { %1122 = vmatmul.mubr.bf16.gmra.mxu0 %v580_v39  ;;  %v488_v39 = vld [vmem:[%s3133_s28 + $0x340] sm:$0xff] }
  0xf4   : > { %1234 = vmatmul.mubr.bf16.gmra.mxu1 %v582_v40  ;;  %1273 = vmatprep.mubr.bf16.mxu0 %v522_v41  ;;  %v495_v40 = vld [vmem:[%s3133_s28 + $0x378] sm:$0xff]  ;;  %v473_v41 = vld [vmem:[%s3133_s28 + $0x2c8] sm:$0xff] }
  0xf5   : > { %1337 = vmatprep.mubr.bf16.mxu1 %v578_v42  ;;  %v480_v42 = vld [vmem:[%s3133_s28 + $0x300] sm:$0xff]  ;;  %v572_v46 = vpack.c.bf16 %v495_v40, %v488_v39 }
  0xf6   : > { %v564_v47 = vpack.c.bf16 %v480_v42, %v473_v41 }
  0xfb   : > { %1274 = vmatmul.mubr.bf16.vlgmr.msra.gmra.mxu0 %v521_v50  ;;  %v479_v50 = vld [vmem:[%s3133_s28 + $0x2f8] sm:$0xff] }
  0xfc   : > { %1338 = vmatmul.mubr.bf16.vlgmr.msra.gmra.mxu1 %v577_v51  ;;  %1281 = vmatprep.mubr.bf16.mxu0 %v529_v52  ;;  %v516_v51 = vld [vmem:[%s3133_s28 + $0x420] sm:$0xff]  ;;  %v487_v52 = vld [vmem:[%s3133_s28 + $0x338] sm:$0xff]  ;;  %v563_v54 = vpack.c.bf16 %v479_v50, %v472_v49 }
  0xfd   : > { %1345 = vmatprep.mubr.bf16.mxu1 %v585_v53  ;;  %2407 = vmatpush3.bf16.msra.mxu1 %v3209_v4  ;;  %v411_v4 = vld [vmem:[%s3133_s28 + $0xd8] sm:$0xff]  ;;  %v494_v53 = vld [vmem:[%s3133_s28 + $0x370] sm:$0xff]  ;;  %v586_v55 = vpack.c.bf16 %v516_v51, %v516_v51 }
  0xfe   : > { %v530_v10 = vpack.c.bf16 %v411_v4, %v404_v3  ;;  %v571_v56 = vpack.c.bf16 %v494_v53, %v487_v52  ;;  %2428 = vmatprep.subr.bf16.mxu1 %v2673_v60  ;;  %v2680_v3 = vld [vmem:[#allocation7] sm:$0xff]  }
 0x103   : > { %1282 = vmatmul.mubr.bf16.gmra.mxu0 %v528_v61  ;;  %v2674_v61 = vld [vmem:[#allocation7 + $0x30] sm:$0xff]  }
 0x104   : > { %1346 = vmatmul.mubr.bf16.gmra.mxu1 %v584_v62  ;;  %1289 = vmatprep.mubr.bf16.mxu0 %v536_v63  ;;  %v2675_v62 = vld [vmem:[#allocation7 + $0x28] sm:$0xff]   ;;  %v2676_v63 = vld [vmem:[#allocation7 + $0x20] sm:$0xff]  }
 0x105   : > { %2408 = vmatprep.mubr.msk.bf16.mxu1 %vm986_vm0, %v523_v0  ;;  %v2677_v0 = vld [vmem:[#allocation7 + $0x18] sm:$0xff]  }
 0x10b   : > { %1290 = vmatmul.mubr.bf16.gmra.mxu0 %v535_v9 }
 0x10c   : > { %2409 = vmatmul.mubr.msk.bf16.vlgmr.msra.gmra.mxu1 %vm986_vm0, %v530_v10  ;;  %1297 = vmatprep.mubr.bf16.mxu0 %v543_v11 }
 0x10d   : > { %2412 = vmatprep.mubr.msk.bf16.mxu1 %vm986_vm0, %v537_v12  ;;  %2429 = vmatpush3.bf16.msra.mxu1 %v2673_v60 }
 0x10e   : > { %2430 = vmatprep.subr.bf16.mxu1 %v2674_v61 }
 0x111   : > { %2431 = vmatpush3.bf16.msra.mxu1 %v2674_v61 }
 0x112   : > { %2432 = vmatprep.subr.bf16.mxu1 %v2675_v62 }
 0x113   : > { %1298 = vmatmul.mubr.bf16.gmra.mxu0 %v542_v21 }
 0x114   : > { %2413 = vmatmul.mubr.msk.bf16.gmra.mxu1 %vm986_vm0, %v544_v22  ;;  %1305 = vmatprep.mubr.bf16.mxu0 %v550_v23 }
 0x115   : > { %2416 = vmatprep.mubr.msk.bf16.mxu1 %vm986_vm0, %v551_v24  ;;  %2433 = vmatpush3.bf16.msra.mxu1 %v2675_v62 }
 0x116   : > { %2434 = vmatprep.subr.bf16.mxu1 %v2676_v63 }
 0x119   : > { %2435 = vmatpush3.bf16.msra.mxu1 %v2676_v63 }
 0x11a   : > { %2436 = vmatprep.subr.bf16.mxu1 %v2677_v0 }
 0x11b   : > { %1306 = vmatmul.mubr.bf16.gmra.mxu0 %v549_v33 }
 0x11c   : > { %2417 = vmatmul.mubr.msk.bf16.gmra.mxu1 %vm986_vm0, %v558_v34  ;;  %1313 = vmatprep.mubr.bf16.mxu0 %v557_v35 }
 0x11d   : > { %2420 = vmatprep.mubr.msk.bf16.mxu1 %vm986_vm0, %v565_v36  ;;  %2437 = vmatpush3.bf16.msra.mxu1 %v2677_v0 }
 0x11e   : > { %2438 = vmatprep.subr.bf16.mxu1 %v2678_v1 }
 0x121   : > { %2439 = vmatpush3.bf16.msra.mxu1 %v2678_v1 }
 0x122   : > { %2440 = vmatprep.subr.bf16.mxu1 %v2679_v2 }
 0x123   : > { %1314 = vmatmul.mubr.bf16.gmra.mxu0 %v556_v45 }
 0x124   : > { %2421 = vmatmul.mubr.msk.bf16.gmra.mxu1 %vm986_vm0, %v572_v46  ;;  %1321 = vmatprep.mubr.bf16.mxu0 %v564_v47 }
 0x125   : > { %2424 = vmatprep.mubr.msk.bf16.mxu1 %vm986_vm0, %v579_v48  ;;  %2441 = vmatpush3.bf16.msra.mxu1 %v2679_v2 }
 0x126   : > { %2442 = vmatprep.subr.bf16.mxu1 %v2680_v3 }
 0x129   : > { %2443 = vmatpush3.bf16.msra.mxu1 %v2680_v3 }
 0x12b   : > { %1322 = vmatmul.mubr.bf16.gmra.mxu0 %v563_v54 }
 0x12c   : > { %2425 = vmatmul.mubr.msk.bf16.gmra.mxu1 %vm986_vm0, %v586_v55  ;;  %1329 = vmatprep.mubr.bf16.mxu0 %v571_v56 }
 0x133   : > { %1330 = vmatmul.mubr.bf16.gmra.mxu0 %v570_v59 }
 0x16b   : > { %v2147_v4 = vpop.f32.mrf.mxu0 }
 0x16c   : > { %v2223_v5 = vpop.f32.mrf.mxu1 }
 0x16d   : > { %v2148_v7 = vpop.f32.mrf.mxu0 }
 0x16e   : > { %v2149_v8 = vadd.f32 %v2148_v7, %v2147_v4  ;;  %v2224_v9 = vpop.f32.mrf.mxu1  ;;  %v2681_v7 = vld [vmem:[#allocation10 + $0x38] sm:$0xff]  }
 0x16f   : > { %v2225_v10 = vadd.f32 %v2224_v9, %v2223_v5  ;;  %v2150_v11 = vpop.f32.mrf.mxu0  ;;  %2464 = vmatprep.subr.bf16.mxu0 %v2681_v7 }
 0x170   : > { %v1052_v12 = vadd.f32 %v2149_v8, %v3298_v6  ;;  %v2226_v13 = vpop.f32.mrf.mxu1  ;;  %v2682_v8 = vld [vmem:[#allocation10 + $0x30] sm:$0xff]   ;;  %2465 = vmatpush3.bf16.msra.mxu0 %v2681_v7 }
 0x171   : > { %v2151_v14 = vpop.f32.mrf.mxu0  ;;  %2466 = vmatprep.subr.bf16.mxu0 %v2682_v8 }
 0x172   : > { %v3301_v15 = vadd.f32 %v2225_v10, %v1052_v12  ;;  %v2152_v16 = vadd.f32 %v2151_v14, %v2150_v11  ;;  %v2227_v17 = vpop.f32.mrf.mxu1 }
 0x173   : > { %v2228_v18 = vadd.f32 %v2227_v17, %v2226_v13  ;;  %v2153_v19 = vpop.f32.mrf.mxu0 }
 0x174   : > { %v1055_v20 = vadd.f32 %v2152_v16, %v3298_v6  ;;  %v2229_v21 = vpop.f32.mrf.mxu1  ;;  %2467 = vmatpush3.bf16.msra.mxu0 %v2682_v8 }
 0x175   : > { %v2154_v22 = vpop.f32.mrf.mxu0 }
 0x176   : > { %v3304_v23 = vadd.f32 %v2228_v18, %v1055_v20  ;;  %v2155_v24 = vadd.f32 %v2154_v22, %v2153_v19  ;;  %v2230_v25 = vpop.f32.mrf.mxu1  ;;  %v2683_v18 = vld [vmem:[#allocation10 + $0x28] sm:$0xff]  }
 0x177   : > { %v2231_v26 = vadd.f32 %v2230_v25, %v2229_v21  ;;  %v2156_v27 = vpop.f32.mrf.mxu0  ;;  %2468 = vmatprep.subr.bf16.mxu0 %v2683_v18 }
 0x178   : > { %v1060_v28 = vadd.f32 %v2155_v24, %v3298_v6  ;;  %v2232_v29 = vpop.f32.mrf.mxu1  ;;  %2469 = vmatpush3.bf16.msra.mxu0 %v2683_v18 }
 0x179   : > { %v2157_v30 = vpop.f32.mrf.mxu0 }
 0x17a   : > { %v3307_v31 = vadd.f32 %v2231_v26, %v1060_v28  ;;  %v2158_v32 = vadd.f32 %v2157_v30, %v2156_v27  ;;  %v2233_v33 = vpop.f32.mrf.mxu1  ;;  %v2684_v28 = vld [vmem:[#allocation10 + $0x20] sm:$0xff]  }
 0x17b   : > { %v2234_v34 = vadd.f32 %v2233_v33, %v2232_v29  ;;  %v2159_v35 = vpop.f32.mrf.mxu0  ;;  %2470 = vmatprep.subr.bf16.mxu0 %v2684_v28 }
 0x17c   : > { %v1063_v36 = vadd.f32 %v2158_v32, %v3298_v6  ;;  %v2235_v37 = vpop.f32.mrf.mxu1  ;;  %2471 = vmatpush3.bf16.msra.mxu0 %v2684_v28 }
 0x17d   : > { %v2160_v38 = vpop.f32.mrf.mxu0 }
 0x17e   : > { %v3310_v39 = vadd.f32 %v2234_v34, %v1063_v36  ;;  %v2161_v40 = vadd.f32 %v2160_v38, %v2159_v35  ;;  %v2236_v41 = vpop.f32.mrf.mxu1  ;;  %v2685_v38 = vld [vmem:[#allocation10 + $0x18] sm:$0xff]  }
 0x17f   : > { %v2237_v42 = vadd.f32 %v2236_v41, %v2235_v37  ;;  %v2162_v43 = vpop.f32.mrf.mxu0  ;;  %2472 = vmatprep.subr.bf16.mxu0 %v2685_v38 }
 0x180   : > { %v1068_v44 = vadd.f32 %v2161_v40, %v3298_v6  ;;  %v2238_v45 = vpop.f32.mrf.mxu1  ;;  %2473 = vmatpush3.bf16.msra.mxu0 %v2685_v38 }
 0x181   : > { %v2163_v46 = vpop.f32.mrf.mxu0 }
 0x182   : > { %v3313_v47 = vadd.f32 %v2237_v42, %v1068_v44  ;;  %v2164_v48 = vadd.f32 %v2163_v46, %v2162_v43  ;;  %v2239_v49 = vpop.f32.mrf.mxu1 }
 0x183   : > { %v2240_v50 = vadd.f32 %v2239_v49, %v2238_v45  ;;  %v2165_v51 = vpop.f32.mrf.mxu0 }
 0x184   : > { %v1071_v52 = vadd.f32 %v2164_v48, %v3298_v6  ;;  %v2241_v53 = vpop.f32.mrf.mxu1 }
 0x185   : > { %v2166_v54 = vpop.f32.mrf.mxu0 }
 0x186   : > { %v3316_v55 = vadd.f32 %v2240_v50, %v1071_v52  ;;  %v2167_v56 = vadd.f32 %v2166_v54, %v2165_v51  ;;  %v2242_v57 = vpop.f32.mrf.mxu1 }
 0x187   : > { %v2243_v58 = vadd.f32 %v2242_v57, %v2241_v53  ;;  %v2168_v59 = vpop.f32.mrf.mxu0 }
 0x188   : > { %v1076_v60 = vadd.f32 %v2167_v56, %v3298_v6  ;;  %v2244_v61 = vpop.f32.mrf.mxu1 }
 0x189   : > { %v2169_v62 = vpop.f32.mrf.mxu0 }
 0x18a   : > { %v3319_v63 = vadd.f32 %v2243_v58, %v1076_v60  ;;  %v2170_v0 = vadd.f32 %v2169_v62, %v2168_v59  ;;  %v2245_v1 = vpop.f32.mrf.mxu1 }
 0x18b   : > { %v2246_v2 = vadd.f32 %v2245_v1, %v2244_v61  ;;  %v2171_v3 = vpop.f32.mrf.mxu0 }
 0x18c   : > { %v1079_v4 = vadd.f32 %v2170_v0, %v3298_v6  ;;  %v2247_v5 = vpop.f32.mrf.mxu1 }
 0x18d   : > { %v2172_v9 = vpop.f32.mrf.mxu0 }
 0x18e   : > { %v3322_v10 = vadd.f32 %v2246_v2, %v1079_v4  ;;  %v2173_v11 = vadd.f32 %v2172_v9, %v2171_v3  ;;  %v2248_v12 = vpop.f32.mrf.mxu1 }
 0x18f   : > { %v2249_v13 = vadd.f32 %v2248_v12, %v2247_v5  ;;  %v2174_v14 = vpop.f32.mrf.mxu0 }
 0x190   : > { %v1084_v16 = vadd.f32 %v2173_v11, %v3298_v6  ;;  %v2250_v17 = vpop.f32.mrf.mxu1 }
 0x191   : > { %v2175_v19 = vpop.f32.mrf.mxu0 }
 0x192   : > { %v3325_v20 = vadd.f32 %v2249_v13, %v1084_v16  ;;  %v2176_v21 = vadd.f32 %v2175_v19, %v2174_v14  ;;  %v2251_v22 = vpop.f32.mrf.mxu1 }
 0x193   : > { %v2252_v24 = vadd.f32 %v2251_v22, %v2250_v17  ;;  %v2177_v25 = vpop.f32.mrf.mxu0 }
 0x194   : > { %v1087_v26 = vadd.f32 %v2176_v21, %v3298_v6  ;;  %v2253_v27 = vpop.f32.mrf.mxu1 }
 0x195   : > { %v2178_v29 = vpop.f32.mrf.mxu0 }
 0x196   : > { %v3328_v30 = vadd.f32 %v2252_v24, %v1087_v26  ;;  %v2179_v32 = vadd.f32 %v2178_v29, %v2177_v25  ;;  %v2254_v33 = vpop.f32.mrf.mxu1 }
 0x197   : > { %v2255_v34 = vadd.f32 %v2254_v33, %v2253_v27  ;;  %v2180_v35 = vpop.f32.mrf.mxu0 }
 0x198   : > { %v1092_v36 = vadd.f32 %v2179_v32, %v3298_v6  ;;  %v2256_v37 = vpop.f32.mrf.mxu1 }
 0x199   : > { %v2181_v40 = vpop.f32.mrf.mxu0 }
 0x19a   : > { %v3331_v41 = vadd.f32 %v2255_v34, %v1092_v36  ;;  %v2182_v42 = vadd.f32 %v2181_v40, %v2180_v35  ;;  %v2257_v43 = vpop.f32.mrf.mxu1 }
 0x19b   : > { %v2258_v44 = vadd.f32 %v2257_v43, %v2256_v37  ;;  %v2183_v45 = vpop.f32.mrf.mxu0 }
 0x19c   : > { %v1095_v46 = vadd.f32 %v2182_v42, %v3298_v6  ;;  %v2259_v48 = vpop.f32.mrf.mxu1 }
 0x19d   : > { %v2184_v49 = vpop.f32.mrf.mxu0 }
 0x19e   : > { %v3334_v50 = vadd.f32 %v2258_v44, %v1095_v46  ;;  %v2185_v51 = vadd.f32 %v2184_v49, %v2183_v45  ;;  %v2260_v52 = vpop.f32.mrf.mxu1 }
 0x19f   : > { %v2261_v53 = vadd.f32 %v2260_v52, %v2259_v48  ;;  %v2186_v54 = vpop.f32.mrf.mxu0 }
 0x1a0   : > { %v1100_v56 = vadd.f32 %v2185_v51, %v3298_v6  ;;  %v2262_v57 = vpop.f32.mrf.mxu1 }
 0x1a1   : > { %v2187_v58 = vpop.f32.mrf.mxu0 }
 0x1a2   : > { %v3337_v59 = vadd.f32 %v2261_v53, %v1100_v56  ;;  %v2188_v60 = vadd.f32 %v2187_v58, %v2186_v54  ;;  %v2263_v61 = vpop.f32.mrf.mxu1 }
 0x1a3   : > { %v2264_v62 = vadd.f32 %v2263_v61, %v2262_v57  ;;  %v2189_v0 = vpop.f32.mrf.mxu0 }
 0x1a4   : > { %v1103_v1 = vadd.f32 %v2188_v60, %v3298_v6  ;;  %v2265_v2 = vpop.f32.mrf.mxu1 }
 0x1a5   : > { %v2190_v3 = vpop.f32.mrf.mxu0 }
 0x1a6   : > { %v3340_v4 = vadd.f32 %v2264_v62, %v1103_v1  ;;  %v2191_v5 = vadd.f32 %v2190_v3, %v2189_v0  ;;  %v2266_v7 = vpop.f32.mrf.mxu1 }
 0x1a7   : > { %v2267_v8 = vadd.f32 %v2266_v7, %v2265_v2  ;;  %v2192_v9 = vpop.f32.mrf.mxu0 }
 0x1a8   : > { %v1108_v11 = vadd.f32 %v2191_v5, %v3298_v6  ;;  %v2268_v12 = vpop.f32.mrf.mxu1 }
 0x1a9   : > { %v2193_v13 = vpop.f32.mrf.mxu0 }
 0x1aa   : > { %v3343_v14 = vadd.f32 %v2267_v8, %v1108_v11  ;;  %v2194_v16 = vadd.f32 %v2193_v13, %v2192_v9  ;;  %v2269_v17 = vpop.f32.mrf.mxu1 }
 0x1ab   : > { %v2270_v18 = vadd.f32 %v2269_v17, %v2268_v12  ;;  %v2195_v19 = vpop.f32.mrf.mxu0 }
 0x1ac   : > { %v1111_v21 = vadd.f32 %v2194_v16, %v3298_v6  ;;  %v2271_v22 = vpop.f32.mrf.mxu1 }
 0x1ad   : > { %v2196_v24 = vpop.f32.mrf.mxu0 }
 0x1ae   : > { %v3346_v25 = vadd.f32 %v2270_v18, %v1111_v21  ;;  %v2197_v26 = vadd.f32 %v2196_v24, %v2195_v19  ;;  %v2272_v27 = vpop.f32.mrf.mxu1 }
 0x1af   : > { %v2273_v28 = vadd.f32 %v2272_v27, %v2271_v22  ;;  %v2198_v29 = vpop.f32.mrf.mxu0 }
 0x1b0   : > { %v1116_v32 = vadd.f32 %v2197_v26, %v3298_v6  ;;  %v2274_v33 = vpop.f32.mrf.mxu1 }
 0x1b1   : > { %v2199_v34 = vpop.f32.mrf.mxu0 }
 0x1b2   : > { %v3349_v35 = vadd.f32 %v2273_v28, %v1116_v32  ;;  %v2200_v36 = vadd.f32 %v2199_v34, %v2198_v29  ;;  %v2275_v37 = vpop.f32.mrf.mxu1 }
 0x1b3   : > { %v2276_v38 = vadd.f32 %v2275_v37, %v2274_v33  ;;  %v2201_v40 = vpop.f32.mrf.mxu0 }
 0x1b4   : > { %v1119_v42 = vadd.f32 %v2200_v36, %v3298_v6  ;;  %v2277_v43 = vpop.f32.mrf.mxu1 }
 0x1b5   : > { %v2202_v44 = vpop.f32.mrf.mxu0 }
 0x1b6   : > { %v3352_v45 = vadd.f32 %v2276_v38, %v1119_v42  ;;  %v2203_v46 = vadd.f32 %v2202_v44, %v2201_v40  ;;  %v2278_v48 = vpop.f32.mrf.mxu1 }
 0x1b7   : > { %v2279_v49 = vadd.f32 %v2278_v48, %v2277_v43  ;;  %v2204_v51 = vpop.f32.mrf.mxu0 }
 0x1b8   : > { %v1124_v52 = vadd.f32 %v2203_v46, %v3298_v6  ;;  %v2280_v53 = vpop.f32.mrf.mxu1 }
 0x1b9   : > { %v2205_v54 = vpop.f32.mrf.mxu0 }
 0x1ba   : > { %v3355_v56 = vadd.f32 %v2279_v49, %v1124_v52  ;;  %v2281_v57 = vpop.f32.mrf.mxu1 }
 0x1bb   : > { %v2299_v58 = vpop.f32.mrf.mxu0 }
 0x1bc   : > { %v3357_v60 = vpop.f32.mrf.mxu1 }
 0x1bd   : > { %v2300_v61 = vpop.f32.mrf.mxu0 }
 0x1be   : > { %v3359_v62 = vpop.f32.mrf.mxu1  ;;  %v2301_v17 = vadd.f32 %v2300_v61, %v2299_v58 }
 0x1bf   : > { %v2302_v0 = vpop.f32.mrf.mxu0 }
 0x1c0   : > { %v3361_v1 = vpop.f32.mrf.mxu1  ;;  %v1276_v29 = vadd.f32 %v2301_v17, %v3301_v15 }
 0x1c1   : > { %v2303_v2 = vpop.f32.mrf.mxu0 }
 0x1c2   : > { %v3363_v3 = vpop.f32.mrf.mxu1  ;;  %v2304_v22 = vadd.f32 %v2303_v2, %v2302_v0 }
 0x1c3   : > { %v2305_v5 = vpop.f32.mrf.mxu0 }
 0x1c4   : > { %v3365_v7 = vpop.f32.mrf.mxu1  ;;  %v1279_v40 = vadd.f32 %v2304_v22, %v3304_v23 }
 0x1c5   : > { %v2306_v6 = vpop.f32.mrf.mxu0 }
 0x1c6   : > { %v3367_v8 = vpop.f32.mrf.mxu1  ;;  %v2307_v12 = vadd.f32 %v2306_v6, %v2305_v5 }
 0x1c7   : > { %v2308_v9 = vpop.f32.mrf.mxu0 }
 0x1c8   : > { %v2356_v11 = vpop.f32.mrf.mxu1  ;;  %v1284_v24 = vadd.f32 %v2307_v12, %v3307_v31 }
 0x1c9   : > { %v2309_v13 = vpop.f32.mrf.mxu0 }
 0x1ca   : > { %v2357_v16 = vpop.f32.mrf.mxu1  ;;  %v2310_v18 = vadd.f32 %v2309_v13, %v2308_v9 }
 0x1cb   : > { %v2311_v19 = vpop.f32.mrf.mxu0 }
 0x1cc   : > { %v2410_v21 = vpop.f32.mrf.mxu1  ;;  %v1287_v33 = vadd.f32 %v2310_v18, %v3310_v39 }
 0x1cd   : > { %v2312_v26 = vpop.f32.mrf.mxu0  ;;  %v1396_v28 = vadd.f32 %v2410_v21, %v1284_v24 }
 0x1ce   : > { %v1387_v27 = vpop.f32.mrf.mxu1  ;;  %v2313_v44 = vadd.f32 %v2312_v26, %v2311_v19 }
 0x1cf   : > { %v2314_v32 = vpop.f32.mrf.mxu0  ;;  %v1388_v36 = vadd.f32 %v1387_v27, %v1276_v29  ;;  %v1467_v43 = vmax.f32 %v1396_v28, 0.0 }
 0x1d0   : > { %v2411_v34 = vpop.f32.mrf.mxu1  ;;  %v1292_v61 = vadd.f32 %v2313_v44, %v3313_v47 }
 0x1d1   : > { %v1399_v37 = vadd.f32 %v2411_v34, %v1287_v33  ;;  %v2315_v38 = vpop.f32.mrf.mxu0  ;;  %v1465_v51 = vmax.f32 %v1388_v36, 0.0 }
 0x1d2   : > { %v1390_v42 = vpop.f32.mrf.mxu1  ;;  %v2316_v53 = vadd.f32 %v2315_v38, %v2314_v32 }
 0x1d3   : > { %v1468_v46 = vmax.f32 %v1399_v37, 0.0  ;;  %v1391_v48 = vadd.f32 %v1390_v42, %v1279_v40  ;;  %v2317_v31 = vpop.f32.mrf.mxu0 }
 0x1d4   : > { %v2414_v49 = vpop.f32.mrf.mxu1  ;;  %v1295_v9 = vadd.f32 %v2316_v53, %v3316_v55 }
 0x1d5   : > { %v1485_v52 = vpack.c.bf16 %v1468_v46, %v1467_v43  ;;  %v1466_v15 = vmax.f32 %v1391_v48, 0.0  ;;  %v2318_v54 = vpop.f32.mrf.mxu0 }
 0x1d6   : > { %v2319_v57 = vadd.f32 %v2318_v54, %v2317_v31  ;;  %v1403_v39 = vpop.f32.mrf.mxu1 }
 0x1d7   : > { %v1484_v58 = vpack.c.bf16 %v1466_v15, %v1465_v51  ;;  %v2320_v0 = vpop.f32.mrf.mxu0  ;;  %v1404_v5 = vadd.f32 %v1403_v39, %v1292_v61 }
 0x1d8   : > { %v1300_v23 = vadd.f32 %v2319_v57, %v3319_v63  ;;  %v2415_v2 = vpop.f32.mrf.mxu1 }
 0x1d9   : > { %2444 = vmatprep.mubr.bf16.mxu1 %v1484_v58  ;;  %v2321_v6 = vpop.f32.mrf.mxu0  ;;  %v1469_v21 = vmax.f32 %v1404_v5, 0.0  ;;  %v2349_v58 = vadd.f32 %v3359_v62, %v3357_v60 }
 0x1da   : > { %v2322_v11 = vadd.f32 %v2321_v6, %v2320_v0  ;;  %v1406_v12 = vpop.f32.mrf.mxu1  ;;  %2445 = vmatmul.mubr.bf16.vlgmr.msra.gmra.mxu1 %v1485_v52  ;;  %v1412_v17 = vadd.f32 %v2414_v49, %v1300_v23 }
 0x1db   : > { %v1407_v13 = vadd.f32 %v1406_v12, %v1295_v9  ;;  %v2323_v16 = vpop.f32.mrf.mxu0 }
 0x1dc   : > { %v1303_v18 = vadd.f32 %v2322_v11, %v3322_v10  ;;  %v2418_v19 = vpop.f32.mrf.mxu1  ;;  %v1471_v29 = vmax.f32 %v1412_v17, 0.0  ;;  %v1340_v11 = vadd.f32 %v2349_v58, %v3349_v35 }
 0x1dd   : > { %v1470_v47 = vmax.f32 %v1407_v13, 0.0  ;;  %v2324_v22 = vpop.f32.mrf.mxu0 }
 0x1de   : > { %v1415_v24 = vadd.f32 %v2415_v2, %v1303_v18  ;;  %v2325_v63 = vadd.f32 %v2324_v22, %v2323_v16  ;;  %v1419_v26 = vpop.f32.mrf.mxu1  ;;  %v2352_v2 = vadd.f32 %v3363_v3, %v3361_v1 }
 0x1df   : > { %v1486_v27 = vpack.c.bf16 %v1470_v47, %v1469_v21  ;;  %v2326_v28 = vpop.f32.mrf.mxu0 }
 0x1e0   : > { %v1472_v32 = vmax.f32 %v1415_v24, 0.0  ;;  %v1308_v55 = vadd.f32 %v2325_v63, %v3325_v20  ;;  %v2419_v33 = vpop.f32.mrf.mxu1 }
 0x1e1   : > { %2448 = vmatprep.mubr.bf16.mxu1 %v1486_v27  ;;  %v2327_v34 = vpop.f32.mrf.mxu0 }
 0x1e2   : > { %v2328_v36 = vadd.f32 %v2327_v34, %v2326_v28  ;;  %v1422_v37 = vpop.f32.mrf.mxu1  ;;  %v1487_v38 = vpack.c.bf16 %v1472_v32, %v1471_v29  ;;  %v1420_v40 = vadd.f32 %v1419_v26, %v1308_v55 }
 0x1e3   : > { %v2329_v10 = vpop.f32.mrf.mxu0 }
 0x1e4   : > { %v1311_v42 = vadd.f32 %v2328_v36, %v3328_v30  ;;  %v2422_v43 = vpop.f32.mrf.mxu1  ;;  %2449 = vmatmul.mubr.bf16.gmra.mxu1 %v1487_v38  ;;  %v1473_v51 = vmax.f32 %v1420_v40, 0.0 }
 0x1e5   : > { %v2330_v44 = vpop.f32.mrf.mxu0 }
 0x1e6   : > { %v1423_v46 = vadd.f32 %v1422_v37, %v1311_v42  ;;  %v2331_v48 = vadd.f32 %v2330_v44, %v2329_v10  ;;  %v1435_v31 = vpop.f32.mrf.mxu1  ;;  %v2355_v37 = vadd.f32 %v3367_v8, %v3365_v7  ;;  %v2687_v7 = vld [vmem:[#allocation10 + $0x8] sm:$0xff]  }
 0x1e7   : > { %v2332_v49 = vpop.f32.mrf.mxu0 }
 0x1e8   : > { %v1474_v52 = vmax.f32 %v1423_v46, 0.0  ;;  %v1316_v20 = vadd.f32 %v2331_v48, %v3331_v41  ;;  %v2423_v53 = vpop.f32.mrf.mxu1  ;;  %v1348_v40 = vadd.f32 %v2355_v37, %v3355_v56 }
 0x1e9   : > { %v2333_v15 = vpop.f32.mrf.mxu0 }
 0x1ea   : > { %v1488_v54 = vpack.c.bf16 %v1474_v52, %v1473_v51  ;;  %v2334_v57 = vadd.f32 %v2333_v15, %v2332_v49  ;;  %v1438_v39 = vpop.f32.mrf.mxu1  ;;  %v1428_v61 = vadd.f32 %v2418_v19, %v1316_v20  ;;  %v2686_v49 = vld [vmem:[#allocation10 + $0x10] sm:$0xff]  }
 0x1eb   : > { %v2335_v30 = vpop.f32.mrf.mxu0  ;;  %2474 = vmatprep.subr.bf16.mxu0 %v2686_v49 }
 0x1ec   : > { %v1319_v0 = vadd.f32 %v2334_v57, %v3334_v50  ;;  %v2426_v23 = vpop.f32.mrf.mxu1  ;;  %2452 = vmatprep.mubr.bf16.mxu1 %v1488_v54  ;;  %v1475_v13 = vmax.f32 %v1428_v61, 0.0  ;;  %v1343_v50 = vadd.f32 %v2352_v2, %v3352_v45  ;;  %2475 = vmatpush3.bf16.msra.mxu0 %v2686_v49 }
 0x1ed   : > { %v2336_v5 = vpop.f32.mrf.mxu0  ;;  %v1460_v46 = vadd.f32 %v2426_v23, %v1348_v40  ;;  %2476 = vmatprep.subr.bf16.mxu0 %v2687_v7 }
 0x1ee   : > { %v1431_v6 = vadd.f32 %v2419_v33, %v1319_v0  ;;  %v2337_v41 = vadd.f32 %v2336_v5, %v2335_v30  ;;  %v1451_v9 = vpop.f32.mrf.mxu1 }
 0x1ef   : > { %v2338_v12 = vpop.f32.mrf.mxu0  ;;  %v1452_v17 = vadd.f32 %v1451_v9, %v1340_v11 }
 0x1f0   : > { %v1476_v16 = vmax.f32 %v1431_v6, 0.0  ;;  %v1324_v60 = vadd.f32 %v2337_v41, %v3337_v59  ;;  %v2427_v62 = vpop.f32.mrf.mxu1  ;;  %2477 = vmatpush3.bf16.msra.mxu0 %v2687_v7 }
 0x1f1   : > { %v2339_v18 = vpop.f32.mrf.mxu0  ;;  %v1481_v35 = vmax.f32 %v1452_v17, 0.0 }
 0x1f2   : > { %v2340_v19 = vadd.f32 %v2339_v18, %v2338_v12  ;;  %v1454_v21 = vpop.f32.mrf.mxu1  ;;  %v1489_v47 = vpack.c.bf16 %v1476_v16, %v1475_v13  ;;  %v1436_v22 = vadd.f32 %v1435_v31, %v1324_v60 }
 0x1f3   : > { %v1455_v1 = vadd.f32 %v1454_v21, %v1343_v50  ;;  %v2341_v3 = vpop.f32.mrf.mxu0 }
 0x1f4   : > { %v1327_v24 = vadd.f32 %v2340_v19, %v3340_v4  ;;  %2453 = vmatmul.mubr.bf16.gmra.mxu1 %v1489_v47  ;;  %v1477_v32 = vmax.f32 %v1436_v22, 0.0 }
 0x1f5   : > { %v1482_v63 = vmax.f32 %v1455_v1, 0.0  ;;  %v2342_v26 = vpop.f32.mrf.mxu0 }
 0x1f6   : > { %v1439_v27 = vadd.f32 %v1438_v39, %v1327_v24  ;;  %v2343_v28 = vadd.f32 %v2342_v26, %v2341_v3 }
 0x1f7   : > { %v1492_v59 = vpack.c.bf16 %v1482_v63, %v1481_v35  ;;  %v2344_v29 = vpop.f32.mrf.mxu0 }
 0x1f8   : > { %v1478_v55 = vmax.f32 %v1439_v27, 0.0  ;;  %v1332_v45 = vadd.f32 %v2343_v28, %v3343_v14  ;;  %v1483_v14 = vmax.f32 %v1460_v46, 0.0 }
 0x1f9   : > { %v2345_v33 = vpop.f32.mrf.mxu0 }
 0x1fa   : > { %v2346_v34 = vadd.f32 %v2345_v33, %v2344_v29  ;;  %v1490_v36 = vpack.c.bf16 %v1478_v55, %v1477_v32  ;;  %v1444_v38 = vadd.f32 %v2422_v43, %v1332_v45  ;;  %v1493_v31 = vpack.c.bf16 %v1483_v14, %v1483_v14  ;;  %v3394_v43 = vld [vmem:[#allocation9] ss:$0 sm:$0xff] }
 0x1fc   : > { %v1335_v4 = vadd.f32 %v2346_v34, %v3346_v25  ;;  %2456 = vmatprep.mubr.bf16.mxu1 %v1490_v36  ;;  %v1479_v42 = vmax.f32 %v1444_v38, 0.0  ;;  %v2688_v25 = vld [vmem:[#allocation10] sm:$0xff]  }
 0x1fd   : > { %2478 = vmatprep.subr.bf16.mxu0 %v2688_v25 }
 0x1fe   : > { %v1447_v10 = vadd.f32 %v2423_v53, %v1335_v4  ;;  %2479 = vmatpush3.bf16.msra.mxu0 %v2688_v25 }
 0x200   : > { %v1480_v44 = vmax.f32 %v1447_v10, 0.0 }
 0x202   : > { %v1491_v48 = vpack.c.bf16 %v1480_v44, %v1479_v42 }
 0x204   : > { %2457 = vmatmul.mubr.bf16.gmra.mxu1 %v1491_v48 }
 0x205   : > { %2460 = vmatprep.mubr.bf16.mxu1 %v1492_v59 }
 0x20c   : > { %2461 = vmatmul.mubr.bf16.gmra.mxu1 %v1493_v31 }
 0x29a   : > { %v2446_v8 = vpop.f32.mrf.mxu1 }
 0x29b   : > { %v1608_v53 = vadd.f32 %v2446_v8, %v3394_v43 }
 0x29c   : > { %v1599_v56 = vpop.f32.mrf.mxu1 }
 0x29d   : > { %v1600_v52 = vadd.f32 %v3394_v43, %v1599_v56  ;;  %v1679_v30 = vmax.f32 %v1608_v53, 0.0  ;;  %v2120_v53 = vld [vmem:[#allocation12] ss:$0 sm:$0xff] }
 0x29e   : > { %v2447_v51 = vpop.f32.mrf.mxu1 }
 0x29f   : > { %v1611_v20 = vadd.f32 %v2447_v51, %v3394_v43  ;;  %v1677_v39 = vmax.f32 %v1600_v52, 0.0 }
 0x2a0   : > { %v1602_v15 = vpop.f32.mrf.mxu1 }
 0x2a1   : > { %v1603_v54 = vadd.f32 %v3394_v43, %v1602_v15  ;;  %v1680_v57 = vmax.f32 %v1611_v20, 0.0 }
 0x2a3   : > { %v1678_v58 = vmax.f32 %v1603_v54, 0.0  ;;  %v1697_v23 = vpack.c.bf16 %v1680_v57, %v1679_v30 }
 0x2a4   : > { %v2450_v61 = vpop.f32.mrf.mxu1 }
 0x2a5   : > { %v1696_v0 = vpack.c.bf16 %v1678_v58, %v1677_v39  ;;  %v1624_v9 = vadd.f32 %v2450_v61, %v3394_v43 }
 0x2a6   : > { %v1615_v2 = vpop.f32.mrf.mxu1 }
 0x2a7   : > { %2480 = vmatprep.mubr.bf16.mxu0 %v1696_v0  ;;  %v1616_v6 = vadd.f32 %v3394_v43, %v1615_v2  ;;  %v1683_v62 = vmax.f32 %v1624_v9, 0.0 }
 0x2a8   : > { %2481 = vmatmul.mubr.bf16.vlgmr.msra.gmra.mxu0 %v1697_v23  ;;  %v2451_v5 = vpop.f32.mrf.mxu1 }
 0x2a9   : > { %v1627_v41 = vadd.f32 %v2451_v5, %v3394_v43  ;;  %v1681_v16 = vmax.f32 %v1616_v6, 0.0 }
 0x2aa   : > { %v1618_v11 = vpop.f32.mrf.mxu1 }
 0x2ab   : > { %v1619_v12 = vadd.f32 %v3394_v43, %v1618_v11  ;;  %v1684_v13 = vmax.f32 %v1627_v41, 0.0 }
 0x2ad   : > { %v1682_v60 = vmax.f32 %v1619_v12, 0.0  ;;  %v1699_v18 = vpack.c.bf16 %v1684_v13, %v1683_v62 }
 0x2af   : > { %v1698_v17 = vpack.c.bf16 %v1682_v60, %v1681_v16 }
 0x2b1   : > { %2484 = vmatprep.mubr.bf16.mxu0 %v1698_v17 }
 0x2b2   : > { %2485 = vmatmul.mubr.bf16.gmra.mxu0 %v1699_v18 }
 0x2b4   : > { %v2454_v50 = vpop.f32.mrf.mxu1 }
 0x2b5   : > { %v1640_v3 = vadd.f32 %v2454_v50, %v3394_v43 }
 0x2b6   : > { %v1631_v19 = vpop.f32.mrf.mxu1 }
 0x2b7   : > { %v1632_v47 = vadd.f32 %v3394_v43, %v1631_v19  ;;  %v1687_v27 = vmax.f32 %v1640_v3, 0.0 }
 0x2b8   : > { %v2455_v21 = vpop.f32.mrf.mxu1 }
 0x2b9   : > { %v1643_v1 = vadd.f32 %v2455_v21, %v3394_v43  ;;  %v1685_v63 = vmax.f32 %v1632_v47, 0.0 }
 0x2ba   : > { %v1634_v22 = vpop.f32.mrf.mxu1 }
 0x2bb   : > { %v1635_v24 = vadd.f32 %v3394_v43, %v1634_v22  ;;  %v1688_v35 = vmax.f32 %v1643_v1, 0.0 }
 0x2bd   : > { %v1686_v26 = vmax.f32 %v1635_v24, 0.0  ;;  %v1701_v59 = vpack.c.bf16 %v1688_v35, %v1687_v27 }
 0x2bf   : > { %v1700_v28 = vpack.c.bf16 %v1686_v26, %v1685_v63 }
 0x2c1   : > { %2488 = vmatprep.mubr.bf16.mxu0 %v1700_v28 }
 0x2c2   : > { %2489 = vmatmul.mubr.bf16.gmra.mxu0 %v1701_v59 }
 0x2c4   : > { %v2458_v29 = vpop.f32.mrf.mxu1 }
 0x2c5   : > { %v1656_v34 = vadd.f32 %v2458_v29, %v3394_v43 }
 0x2c6   : > { %v1647_v32 = vpop.f32.mrf.mxu1 }
 0x2c7   : > { %v1648_v45 = vadd.f32 %v3394_v43, %v1647_v32  ;;  %v1691_v42 = vmax.f32 %v1656_v34, 0.0 }
 0x2c8   : > { %v2459_v55 = vpop.f32.mrf.mxu1 }
 0x2c9   : > { %v1659_v33 = vadd.f32 %v2459_v55, %v3394_v43  ;;  %v1689_v10 = vmax.f32 %v1648_v45, 0.0 }
 0x2ca   : > { %v1650_v36 = vpop.f32.mrf.mxu1 }
 0x2cb   : > { %v1651_v37 = vadd.f32 %v3394_v43, %v1650_v36  ;;  %v1692_v38 = vmax.f32 %v1659_v33, 0.0 }
 0x2cc   : > { %v2462_v4 = vpop.f32.mrf.mxu1 }
 0x2cd   : > { %v1690_v40 = vmax.f32 %v1651_v37, 0.0  ;;  %v1703_v48 = vpack.c.bf16 %v1692_v38, %v1691_v42  ;;  %v1672_v14 = vadd.f32 %v2462_v4, %v3394_v43 }
 0x2ce   : > { %v1663_v44 = vpop.f32.mrf.mxu1 }
 0x2cf   : > { %v1702_v46 = vpack.c.bf16 %v1690_v40, %v1689_v10  ;;  %v1664_v49 = vadd.f32 %v3394_v43, %v1663_v44  ;;  %v1695_v8 = vmax.f32 %v1672_v14, 0.0 }
 0x2d0   : > { %v2463_v31 = vpop.f32.mrf.mxu1 }
 0x2d1   : > { %2492 = vmatprep.mubr.bf16.mxu0 %v1702_v46  ;;  %v1693_v56 = vmax.f32 %v1664_v49, 0.0  ;;  %v1705_v20 = vpack.c.bf16 %v1695_v8, %v1695_v8 }
 0x2d2   : > { %v1666_v7 = vpop.f32.mrf.mxu1  ;;  %2493 = vmatmul.mubr.bf16.gmra.mxu0 %v1703_v48 }
 0x2d3   : > { %v1667_v25 = vadd.f32 %v3394_v43, %v1666_v7 }
 0x2d5   : > { %v1694_v51 = vmax.f32 %v1667_v25, 0.0 }
 0x2d7   : > { %v1704_v52 = vpack.c.bf16 %v1694_v51, %v1693_v56 }
 0x2d9   : > { %2496 = vmatprep.mubr.bf16.mxu0 %v1704_v52 }
 0x2da   : > { %2497 = vmatmul.mubr.bf16.gmra.mxu0 %v1705_v20 }
 0x368   : > { %v2482_v43 = vpop.f32.mrf.mxu0 }
 0x369   : > { %v1820_v15 = vadd.f32 %v2482_v43, %v2120_v53 }
 0x36a   : > { %v1811_v54 = vpop.f32.mrf.mxu0 }
 0x36b   : > { %1891 = vst [vmem:[%s3420_s24 + $0x10] sm:$0xff] %v1820_v15  ;;  %v1812_v57 = vadd.f32 %v2120_v53, %v1811_v54 }
 0x36c   : > { %v2483_v39 = vpop.f32.mrf.mxu0 }
 0x36d   : > { %1889 = vst [vmem:[%s3420_s24] sm:$0xff] %v1812_v57  ;;  %v1823_v58 = vadd.f32 %v2483_v39, %v2120_v53 }
 0x36e   : > { %v1814_v30 = vpop.f32.mrf.mxu0 }
 0x36f   : > { %1892 = vst [vmem:[%s3420_s24 + $0x18] sm:$0xff] %v1823_v58  ;;  %v1815_v61 = vadd.f32 %v2120_v53, %v1814_v30 }
 0x371   : > { %1890 = vst [vmem:[%s3420_s24 + $0x8] sm:$0xff] %v1815_v61 }
 0x372   : > { %v2486_v0 = vpop.f32.mrf.mxu0 }
 0x373   : > { %v1836_v23 = vadd.f32 %v2486_v0, %v2120_v53 }
 0x374   : > { %v1827_v2 = vpop.f32.mrf.mxu0 }
 0x375   : > { %1895 = vst [vmem:[%s3420_s24 + $0x30] sm:$0xff] %v1836_v23  ;;  %v1828_v5 = vadd.f32 %v2120_v53, %v1827_v2 }
 0x376   : > { %v2487_v6 = vpop.f32.mrf.mxu0 }
 0x377   : > { %1893 = vst [vmem:[%s3420_s24 + $0x20] sm:$0xff] %v1828_v5  ;;  %v1839_v41 = vadd.f32 %v2487_v6, %v2120_v53 }
 0x378   : > { %v1830_v9 = vpop.f32.mrf.mxu0 }
 0x379   : > { %1896 = vst [vmem:[%s3420_s24 + $0x38] sm:$0xff] %v1839_v41  ;;  %v1831_v11 = vadd.f32 %v2120_v53, %v1830_v9 }
 0x37b   : > { %1894 = vst [vmem:[%s3420_s24 + $0x28] sm:$0xff] %v1831_v11 }
 0x382   : > { %v2490_v12 = vpop.f32.mrf.mxu0 }
 0x383   : > { %v1852_v13 = vadd.f32 %v2490_v12, %v2120_v53 }
 0x384   : > { %v1843_v16 = vpop.f32.mrf.mxu0 }
 0x385   : > { %1899 = vst [vmem:[%s3420_s24 + $0x50] sm:$0xff] %v1852_v13  ;;  %v1844_v60 = vadd.f32 %v2120_v53, %v1843_v16 }
 0x386   : > { %v2491_v62 = vpop.f32.mrf.mxu0 }
 0x387   : > { %1897 = vst [vmem:[%s3420_s24 + $0x40] sm:$0xff] %v1844_v60  ;;  %v1855_v17 = vadd.f32 %v2491_v62, %v2120_v53 }
 0x388   : > { %v1846_v18 = vpop.f32.mrf.mxu0 }
 0x389   : > { %1900 = vst [vmem:[%s3420_s24 + $0x58] sm:$0xff] %v1855_v17  ;;  %v1847_v50 = vadd.f32 %v2120_v53, %v1846_v18 }
 0x38b   : > { %1898 = vst [vmem:[%s3420_s24 + $0x48] sm:$0xff] %v1847_v50 }
 0x392   : > { %v2494_v19 = vpop.f32.mrf.mxu0 }
 0x393   : > { %v1868_v21 = vadd.f32 %v2494_v19, %v2120_v53 }
 0x394   : > { %v1859_v47 = vpop.f32.mrf.mxu0 }
 0x395   : > { %1903 = vst [vmem:[%s3420_s24 + $0x70] sm:$0xff] %v1868_v21  ;;  %v1860_v1 = vadd.f32 %v2120_v53, %v1859_v47 }
 0x396   : > { %v2495_v3 = vpop.f32.mrf.mxu0 }
 0x397   : > { %1901 = vst [vmem:[%s3420_s24 + $0x60] sm:$0xff] %v1860_v1  ;;  %v1871_v22 = vadd.f32 %v2495_v3, %v2120_v53 }
 0x398   : > { %v1862_v24 = vpop.f32.mrf.mxu0 }
 0x399   : > { %1904 = vst [vmem:[%s3420_s24 + $0x78] sm:$0xff] %v1871_v22  ;;  %v1863_v35 = vadd.f32 %v2120_v53, %v1862_v24 }
 0x39a   : > { %v2498_v63 = vpop.f32.mrf.mxu0 }
 0x39b   : > { %1902 = vst [vmem:[%s3420_s24 + $0x68] sm:$0xff] %v1863_v35  ;;  %v1884_v26 = vadd.f32 %v2498_v63, %v2120_v53 }
 0x39c   : > { %v1875_v27 = vpop.f32.mrf.mxu0 }
 0x39d   : > { %1907 = vst [vmem:[%s3420_s24 + $0x90] sm:$0xff] %v1884_v26  ;;  %v1876_v28 = vadd.f32 %v2120_v53, %v1875_v27 }
 0x39e   : > { %v2499_v59 = vpop.f32.mrf.mxu0 }
 0x39f   : > { %1905 = vst [vmem:[%s3420_s24 + $0x80] sm:$0xff] %v1876_v28 }
 0x3a0   : > { %v1878_v29 = vpop.f32.mrf.mxu0 }
 0x3a1   : > { %v1879_v32 = vadd.f32 %v2120_v53, %v1878_v29 }
 0x3a3   : > { %1906 = vst [vmem:[%s3420_s24 + $0x88] sm:$0xff] %v1879_v32 }
 0x3a4 PF: > { %p20_p1 = scmp.ge.s32.totalorder %s3076_s15, 4   ;;  %s3476_s24 = smov %s2911_s25 }
 0x3a5   : > { %s3477_s25 = smov %s2915_s26  ;;  %s3478_s26 = smov %s3087_s21 }
 0x3a6   : > { %s3479_s27 = smov %s3076_s15  ;;  %22 = sbr.rel (!%p20_p1) target bundleno = 6 (0x6), region = 112 }
 0x3ab   :  { %1930 = vsyncpa [#allocation3], 1 }
 0x3ac   :  { %1932 = vsyncpa [#allocation3 + $0x1], 1 }
 0x3ad   :  { %1933 = vsyncpa [#allocation5], 1 }
 0x3ae   :  { %1934 = vsyncpa [#allocation8], 1 }
 0x3af   :  { %1935 = vsyncpa [#allocation11], 1 }

</bundles_post_ra>
